<compile_context>
chip_gen: v7x
topology: tpu7x:2x2x1
jax: 0.10.0
libtpu: 0.0.40
codegen_flags: <defaults>
</compile_context>

<pallas_src>
import functools

import jax
import jax.numpy as jnp
from jax.experimental import pallas as pl
from jax.experimental.pallas import tpu as pltpu


def _pick_tile(total, candidates, multiple):
    """Largest candidate that divides `total` and is a multiple of `multiple`,
    else the full (untiled) extent."""
    for c in candidates:
        if c <= total and total % c == 0 and c % multiple == 0:
            return c
    return total


def prepare_maxout_params(weight, bias, pool_size, *, tn=None,
                          compute_dtype=jnp.bfloat16):
    """One-time parameter preprocessing (call once, outside the training/infer step).

    weight: (n_out * pool_size, D_in)  -- torch nn.Linear layout (y = x @ W.T + b)
    bias:   (n_out * pool_size,)
    Returns (w_slab, b_slab, tn):
      w_slab: (D_in, n_tiles*pool*tn) in `compute_dtype`
      b_slab: (1,    n_tiles*pool*tn) in float32
    """
    n_total, d_in = weight.shape
    assert n_total % pool_size == 0
    n_out = n_total // pool_size
    if tn is None:
        tn = _pick_tile(n_out, (512, 256, 128), 128)
    assert n_out % tn == 0
    n_tiles = n_out // tn

    # torch: view(B, n_out, pool) => linear column c = u*pool + p (unit u, slot p).
    # slab column for (tile j, slot p, local unit t) = j*pool*tn + p*tn + t, u = j*tn + t.
    w_r = weight.reshape(n_tiles, tn, pool_size, d_in)            # [j, t, p, d]
    w_slab = jnp.transpose(w_r, (3, 0, 2, 1)).reshape(d_in, n_tiles * pool_size * tn)
    b_r = bias.reshape(n_tiles, tn, pool_size)                    # [j, t, p]
    b_slab = jnp.transpose(b_r, (0, 2, 1)).reshape(1, n_tiles * pool_size * tn)

    return w_slab.astype(compute_dtype), b_slab.astype(jnp.float32), tn


def _maxout_kernel(x_ref, w_ref, b_ref, o_ref, acc_ref, *, pool_size, tn):
    # x_ref:   (TB, TK)        bf16 activations
    # w_ref:   (TK, pool*TN)   bf16 weight slab tile
    # b_ref:   (1,  pool*TN)   f32 bias tile
    # o_ref:   (TB, TN)        output tile
    # acc_ref: (TB, pool*TN)   f32 accumulator over the K grid axis
    k = pl.program_id(2)

    @pl.when(k == 0)
    def _():
        acc_ref[...] = jnp.zeros_like(acc_ref)

    acc_ref[...] += jnp.dot(x_ref[...], w_ref[...],
                            preferred_element_type=jnp.float32)

    @pl.when(k == pl.num_programs(2) - 1)
    def _():
        y = acc_ref[...] + b_ref[...]              # (TB, pool*TN), f32
        m = y[:, 0:tn]
        for p in range(1, pool_size):              # static, lane-aligned slices -> VPU max
            m = jnp.maximum(m, y[:, p * tn:(p + 1) * tn])
        o_ref[...] = m.astype(o_ref.dtype)


def maxout_forward(x, w_slab, b_slab, *, pool_size, tn, d_out=None, tb=None, tk=None):
    """Pallas maxout forward.  (w_slab, b_slab, tn) come from prepare_maxout_params()."""
    shape = list(x.shape)
    B = shape[0]
    x_flat = jnp.reshape(x, (B, -1))
    d_in = w_slab.shape[0]
    n_out = w_slab.shape[1] // pool_size
    assert x_flat.shape[1] == d_in
    if d_out is not None:
        # Same (fragile) semantics as the torch module: only the last dim is replaced.
        shape[-1] = d_out

    if tb is None:
        tb = _pick_tile(B, (512, 256, 128, 64, 32, 16, 8), 8)
    if tk is None:
        tk = _pick_tile(d_in, (2048, 1024, 512, 256, 128), 128)

    grid = (B // tb, n_out // tn, d_in // tk)      # reduction (K) axis innermost

    x_c = x_flat.astype(w_slab.dtype)              # bf16 compute path

    out = pl.pallas_call(
        functools.partial(_maxout_kernel, pool_size=pool_size, tn=tn),
        out_shape=jax.ShapeDtypeStruct((B, n_out), x.dtype),
        grid_spec=pltpu.PrefetchScalarGridSpec(
            num_scalar_prefetch=0,
            grid=grid,
            in_specs=[
                pl.BlockSpec((tb, tk), lambda b, j, k: (b, k)),
                pl.BlockSpec((tk, pool_size * tn), lambda b, j, k: (k, j)),
                pl.BlockSpec((1, pool_size * tn), lambda b, j, k: (0, j)),
            ],
            out_specs=pl.BlockSpec((tb, tn), lambda b, j, k: (b, j)),
            scratch_shapes=[pltpu.VMEM((tb, pool_size * tn), jnp.float32)],
        ),
        compiler_params=pltpu.CompilerParams(
            dimension_semantics=("parallel", "parallel", "arbitrary")),
    )(x_c, w_slab, b_slab)

    return jnp.reshape(out, shape)


def maxout_reference(x, weight, bias, pool_size, d_out=None):
    shape = list(x.shape)
    B = shape[0]
    x_flat = jnp.reshape(x, (B, -1))
    if d_out is not None:
        shape[-1] = d_out
    y = x_flat @ weight.T + bias
    y = jnp.reshape(y, (B, y.shape[1] // pool_size, pool_size))
    return jnp.reshape(jnp.max(y, axis=-1), shape)


if __name__ == "__main__":
    key = jax.random.PRNGKey(0)
    kx, kw = jax.random.split(key)

    # Small NCHW input, consistent with how Maxout is typically applied post-conv.
    B, C, H, W = 2, 4, 16, 16
    pool_size = 2
    d_out = None                      # shape-preserving maxout
    x = jax.random.normal(kx, (B, C, H, W), dtype=jnp.float32)

    D_in = C * H * W                  # flattened feature size = 1024
    n_out = D_in if d_out is None else d_out

    # Deterministic kaiming_uniform_(a=0, nonlinearity='relu') equivalent:
    # gain = sqrt(2), fan_in = D_in, bound = gain * sqrt(3 / fan_in)
    bound = jnp.sqrt(2.0) * jnp.sqrt(3.0 / D_in)
    weight = jax.random.uniform(kw, (n_out * pool_size, D_in),
                                minval=-bound, maxval=bound, dtype=jnp.float32)
    bias = jnp.zeros((n_out * pool_size,), dtype=jnp.float32)

    # One-time parameter preprocessing (hoisted out of the per-step path).
    w_slab, b_slab, tn = prepare_maxout_params(weight, bias, pool_size)

    fwd = jax.jit(maxout_forward,
                  static_argnames=("pool_size", "tn", "d_out", "tb", "tk"))
    out = jax.block_until_ready(
        fwd(x, w_slab, b_slab, pool_size=pool_size, tn=tn, d_out=d_out))

    ref = maxout_reference(x, weight, bias, pool_size, d_out)
    assert out.shape == (B, C, H, W)
    # bf16 weight/activation path (f32 accumulation) vs f32 reference.
    assert bool(jnp.allclose(out, ref, atol=3e-2, rtol=3e-2)), \
        float(jnp.max(jnp.abs(out - ref)))

    print("KERNEL_OK")
</pallas_src>

<mosaic_0001>
module attributes {stable_mosaic.version = 11 : i64} {
  func.func @_maxout_kernel(%arg0: i32, %arg1: i32, %arg2: i32, %arg3: memref<2x1024xbf16, #tpu.memory_space<vmem>>, %arg4: memref<1024x1024xbf16, #tpu.memory_space<vmem>>, %arg5: memref<1x1024xf32, #tpu.memory_space<vmem>>, %arg6: memref<2x512xf32, #tpu.memory_space<vmem>>, %arg7: memref<2x1024xf32, #tpu.memory_space<vmem>>) attributes {dimension_semantics = [#tpu.dimension_semantics<parallel>, #tpu.dimension_semantics<parallel>, #tpu.dimension_semantics<arbitrary>], iteration_bounds = array<i64: 1, 2, 1>, scalar_prefetch = 0 : i64, scratch_operands = 1 : i64, tpu.core_type = #tpu.core_type<tc>, window_params = [{transform_indices = @transform_0, window_bounds = array<i64: 2, 1024>}, {transform_indices = @transform_1, window_bounds = array<i64: 1024, 1024>}, {transform_indices = @transform_2, window_bounds = array<i64: 1, 1024>}, {transform_indices = @transform_3, window_bounds = array<i64: 2, 512>}]} {
    %c0_i32 = arith.constant 0 : i32
    %0 = arith.cmpi eq, %arg2, %c0_i32 : i32
    %1 = arith.extui %0 : i1 to i32
    %c0_i32_0 = arith.constant 0 : i32
    %2 = arith.cmpi ne, %1, %c0_i32_0 : i32
    scf.if %2 {
      %cst_10 = arith.constant 0.000000e+00 : f32
      %12 = vector.broadcast %cst_10 : f32 to vector<2x1024xf32>
      %c0_11 = arith.constant 0 : index
      %c0_12 = arith.constant 0 : index
      %13 = vector.load %arg7[%c0_11, %c0_12] : memref<2x1024xf32, #tpu.memory_space<vmem>>, vector<2x1024xf32>
      tpu.vector_store %arg7[%c0_11, %c0_12], %12 {strides = array<i32>} : memref<2x1024xf32, #tpu.memory_space<vmem>>, vector<2x1024xf32>,
    } else {
    }
    %c0 = arith.constant 0 : index
    %c0_1 = arith.constant 0 : index
    %3 = vector.load %arg7[%c0, %c0_1] : memref<2x1024xf32, #tpu.memory_space<vmem>>, vector<2x1024xf32>
    %c0_2 = arith.constant 0 : index
    %c0_3 = arith.constant 0 : index
    %4 = vector.load %arg3[%c0_2, %c0_3] : memref<2x1024xbf16, #tpu.memory_space<vmem>>, vector<2x1024xbf16>
    %c0_4 = arith.constant 0 : index
    %c0_5 = arith.constant 0 : index
    %5 = vector.load %arg4[%c0_4, %c0_5] : memref<1024x1024xbf16, #tpu.memory_space<vmem>>, vector<1024x1024xbf16>
    %cst = arith.constant dense<0.000000e+00> : vector<2x1024xf32>
    %6 = tpu.matmul %4, %5, %cst {dimension_numbers = #tpu.dot_dimension_numbers<[1], [0], [0], [1], [0, 0, 1, 1], [], []>} : vector<2x1024xbf16>, vector<1024x1024xbf16>, vector<2x1024xf32> -> vector<2x1024xf32>
    %7 = arith.addf %3, %6 : vector<2x1024xf32>
    %c0_6 = arith.constant 0 : index
    %c0_7 = arith.constant 0 : index
    %8 = vector.load %arg7[%c0_6, %c0_7] : memref<2x1024xf32, #tpu.memory_space<vmem>>, vector<2x1024xf32>
    tpu.vector_store %arg7[%c0_6, %c0_7], %7 {strides = array<i32>} : memref<2x1024xf32, #tpu.memory_space<vmem>>, vector<2x1024xf32>,
    %c0_i32_8 = arith.constant 0 : i32
    %9 = arith.cmpi eq, %arg2, %c0_i32_8 : i32
    %10 = arith.extui %9 : i1 to i32
    %c0_i32_9 = arith.constant 0 : i32
    %11 = arith.cmpi ne, %10, %c0_i32_9 : i32
    scf.if %11 {
      %c0_10 = arith.constant 0 : index
      %c0_11 = arith.constant 0 : index
      %12 = vector.load %arg7[%c0_10, %c0_11] : memref<2x1024xf32, #tpu.memory_space<vmem>>, vector<2x1024xf32>
      %c0_12 = arith.constant 0 : index
      %c0_13 = arith.constant 0 : index
      %13 = vector.load %arg5[%c0_12, %c0_13] : memref<1x1024xf32, #tpu.memory_space<vmem>>, vector<1x1024xf32>
      %14 = vector.broadcast %13 : vector<1x1024xf32> to vector<2x1024xf32>
      %15 = arith.addf %12, %14 : vector<2x1024xf32>
      %16 = vector.extract_strided_slice %15 {offsets = [0, 0], sizes = [2, 512], strides = [1, 1]} : vector<2x1024xf32> to vector<2x512xf32>
      %17 = vector.extract_strided_slice %15 {offsets = [0, 512], sizes = [2, 512], strides = [1, 1]} : vector<2x1024xf32> to vector<2x512xf32>
      %18 = arith.maximumf %16, %17 : vector<2x512xf32>
      %c0_14 = arith.constant 0 : index
      %c0_15 = arith.constant 0 : index
      %19 = vector.load %arg6[%c0_14, %c0_15] : memref<2x512xf32, #tpu.memory_space<vmem>>, vector<2x512xf32>
      tpu.vector_store %arg6[%c0_14, %c0_15], %18 {strides = array<i32>} : memref<2x512xf32, #tpu.memory_space<vmem>>, vector<2x512xf32>,
    } else {
    }
    return
  }
  func.func @transform_0(%arg0: i32, %arg1: i32, %arg2: i32) -> (i32, i32) {
    %c0_i32 = arith.constant 0 : i32
    return %arg0, %arg2 : i32, i32
  }
  func.func @transform_1(%arg0: i32, %arg1: i32, %arg2: i32) -> (i32, i32) {
    %c0_i32 = arith.constant 0 : i32
    return %arg2, %arg1 : i32, i32
  }
  func.func @transform_2(%arg0: i32, %arg1: i32, %arg2: i32) -> (i32, i32) {
    %c0_i32 = arith.constant 0 : i32
    %c0_i32_0 = arith.constant 0 : i32
    return %c0_i32, %arg1 : i32, i32
  }
  func.func @transform_3(%arg0: i32, %arg1: i32, %arg2: i32) -> (i32, i32) {
    %c0_i32 = arith.constant 0 : i32
    return %arg0, %arg1 : i32, i32
  }
}

</mosaic_0001>

<bundles_post_ra>
// kernel: maxout_forward.1
= control target key start
LH: loop header
LB: loop body
LE: loop exit
PB: predicated region body
PF: predicated region fallthrough
CT: control target
= control target key end

     0   :  { %8 = vsyncpa [#allocation4], 0  ;;  %s5940_s0 = inlined_call_operand.vmem [shape: bf16[2,1024], index: 0, kind: input, shape index: {}]   ;;  %s5941_s1 = inlined_call_operand.hbm [shape: bf16[1024,2048], index: 1, kind: input, shape index: {}]   ;;  %s5942_s2 = inlined_call_operand.hbm [shape: f32[1,2048], index: 2, kind: input, shape index: {}]   ;;  %s5943_s3 = inlined_call_operand.vmem [shape: f32[2,1024], index: 3, kind: output, shape index: {}]  }
   0x1   :  { %10 = vsyncpa [#allocation4 + $0x1], 0 }
   0x2   :  { %11 = vsyncpa [#allocation6], 0 }
   0x3   :  { %13 = vsyncpa [#allocation6 + $0x1], 0  ;;  %s5150_s12 = smov 0   ;;  %s5152_s13 = smov 0  }
   0x4   :  { %s5154_s14 = smov 0   ;;  %s5156_s15 = smov 0  }
   0x5   :  { %s5158_s16 = smov 0   ;;  %s5160_s17 = smov 0  }
   0x6 LB: > { %s4361_s18 = sadd.s32 4294967295, %s5121_s17   ;;  %s34_s19 = sadd.s32 1, %s5117_s16  ;;  %s5121_s17 = sphi %s5160_s17, %s19_s17   ;;  %s5117_s16 = sphi %s5158_s16, %s5956_s16   ;;  %s5113_s15 = sphi %s5156_s15, %s5955_s15   ;;  %s5109_s14 = sphi %s5154_s14, %s5954_s14   ;;  %s5105_s13 = sphi %s5152_s13, %s5953_s13   ;;  %s5101_s12 = sphi %s5150_s12, %s5952_s12  }
   0x7   : > { %p36_p0 = scmp.ge.s32.totalorder %s34_s19, 2  ;;  %s75_s20 = sadd.s32 1, %s5109_s14 }
   0x8   : > { %p82_p1 = scmp.ne.s32.totalorder %s5109_s14, %s5105_s13  ;;  %p83_p2 = scmp.eq.s32.totalorder %s5121_s17, 0 }
   0x9   : > { %s5958_s19 = smov (%p36_p0, %s34_s19), 0  ;;  %p88_p4 = scmp.ne.s32.totalorder %s5105_s13, %s5101_s12 }
   0xa   : > { %p5186_p3 = por %p83_p2, %p82_p1  ;;  %s71_s22 = ssub.s32 %s5117_s16, %s5958_s19 }
   0xb   : > { %p89_p5 = scmp.eq.s32.totalorder %s4361_s18, 0  ;;  %p73_p6 = scmp.eq.s32.totalorder %s71_s22, 0 }
   0xc   : > { %p4952_p8 = scmp.lt.s32.totalorder %s5121_s17, 2  ;;  %s5202_s25 = sand.u32 1, %s5109_s14  }
   0xd   : > { %p5193_p7 = por %p89_p5, %p88_p4  ;;  %s4891_s26 = sshll.u32 %s5117_s16, 9 }
   0xe   : > { %s5199_s24 = scalar_select %p73_p6, %s5109_s14, %s75_s20  }
   0xf   : > { %s5946_s23 = scalar_select %p5193_p7, 1, 0 }
  0x10   : > { %s4366_s27 = sshll.u32 %s5202_s25, 12  ;;  %s5209_s30 = scalar_lea.hbm %s5941_s1, %s4891_s26 }
  0x11   : > { %s182_s4 = scalar_lea.vmem [#allocation3], %s4366_s27  ;;  %p5213_p9 = pnand %p4952_p8, %p5186_p3 }
  0x12   : > { %s192_s5 = sshll.u32 %s182_s4, 4  ;;  %s179_s7 = scalar_lea.sflag [#allocation4], %s5202_s25  ;;  %s5217_s5 = int_to_ptr.vmem [resolvable:$true] %s192_s5 }
  0x13   : > { %s5007_s8 = scalar_lea.hbm %s5209_s30, 65536  ;;  %p5009_p12 = pneg %p5213_p9 }
  0x14   : > { %p5008_p11 = scmp.ne.s32.totalorder %s5209_s30, %s5007_s8  ;;  %s5012_s11 = scalar_lea.hbm %s5941_s1, 131072 }
  0x15   : > { %p5013_p1 = scmp.lt.u32.totalorder %s5209_s30, %s5941_s1  ;;  %p5014_p2 = scmp.lt.u32.totalorder %s5012_s11, %s5007_s8 }
  0x16   : > { %p5010_p13 = pnand %p5009_p12, %p5008_p11  ;;  %p5016_p4 = scmp.lt.u32.totalorder %s5007_s8, %s5209_s30 }
  0x17   : > { %p5015_p3 = por %p5014_p2, %p5013_p1 }
  0x18   : > { %p5011_p0 = pneg %p5010_p13 }
  0x19   : > { %p5017_p5 = por %p5016_p4, %p5015_p3 }
  0x1b   : > { %p5018_p6 = pnand %p5017_p5, %p5011_p0 }
  0x1d   : > { %5021 = shalt.err (!%p5018_p6)
}
  0x1e   : > { %s5022_s20 = scalar_lea.vmem %s5217_s5, 65536  ;;  %s5123_s21 = smov [#allocation3]  }
  0x1f   : > { %p5023_p8 = scmp.ne.s32.totalorder %s5217_s5, %s5022_s20  ;;  %s5027_s22 = sshll.u32 %s5123_s21, 4  ;;  %s5028_s22 = int_to_ptr.vmem [resolvable:$false] %s5027_s22 }
  0x20   : > { %s5029_s26 = scalar_lea.vmem %s5028_s22, 131072  ;;  %p5030_p10 = scmp.lt.s32.totalorder %s5217_s5, %s5028_s22 }
  0x21   : > { %p5025_p11 = pnand %p5023_p8, %p5009_p12  ;;  %p5031_p1 = scmp.lt.s32.totalorder %s5029_s26, %s5022_s20 }
  0x23   : > { %p5026_p13 = pneg %p5025_p11  ;;  %p5032_p2 = por %p5031_p1, %p5030_p10 }
  0x25   : > { %p5033_p3 = pnand %p5032_p2, %p5026_p13 }
  0x27   : > { %5036 = shalt.err (!%p5033_p3)
}
  0x28   : > { %s5124_s27 = smov 1024   ;;  %s5125_s28 = smov 512  }
  0x29   : > { %s5126_s29 = smov 32   ;;  %p219_p0 = scmp.lt.s32.totalorder %s5121_s17, 3 }
  0x2a   : > { %4948 = dma.hbm_to_vmem [thread:$0]  (!%p5213_p9), %s5209_s30, 65536, %s5217_s5, %s179_s7, %s5124_s27, %s5125_s28, %s5126_s29  }
  0x2b   : > { %s4369_s4 = sshll.u32 %s5202_s25, 3  ;;  %s4892_s8 = sshll.u32 %s5117_s16, 7 }
  0x2c   : > { %p5948_p10 = scmp.ge.s32.totalorder %s5121_s17, 1  ;;  %s5260_s12 = scalar_lea.hbm %s5942_s2, %s4892_s8 }
  0x2d   : > { %s206_s18 = scalar_lea.vmem [#allocation5], %s4369_s4  ;;  %s203_s30 = scalar_lea.sflag [#allocation6], %s5202_s25 }
  0x2e   : > { %p5253_p4 = pnand %p5948_p10, %p219_p0  ;;  %s214_s20 = sshll.u32 %s206_s18, 4  ;;  %s215_s20 = int_to_ptr.vmem [resolvable:$true] %s214_s20 }
  0x2f   : > { %s5037_s5 = scalar_lea.hbm %s5260_s12, 128  ;;  %s5042_s22 = scalar_lea.hbm %s5942_s2, 256 }
  0x30   : > { %s5949_s9 = scalar_select %p5253_p4, 1, 0 }
  0x31   : > { %p5038_p5 = scmp.ne.s32.totalorder %s5260_s12, %s5037_s5  ;;  %p5043_p11 = scmp.lt.u32.totalorder %s5260_s12, %s5942_s2 }
  0x32   : > { %p5044_p13 = scmp.lt.u32.totalorder %s5042_s22, %s5037_s5  ;;  %p5046_p2 = scmp.lt.u32.totalorder %s5037_s5, %s5260_s12 }
  0x33   : > { %p5040_p6 = pnand %p5038_p5, %p5009_p12 }
  0x34   : > { %p5045_p1 = por %p5044_p13, %p5043_p11 }
  0x35   : > { %p5041_p8 = pneg %p5040_p6 }
  0x36   : > { %p5047_p3 = por %p5046_p2, %p5045_p1 }
  0x38   : > { %p5048_p0 = pnand %p5047_p3, %p5041_p8 }
  0x3a   : > { %5051 = shalt.err (!%p5048_p0)
}
  0x3b   : > { %s5052_s25 = scalar_lea.vmem %s215_s20, 128  ;;  %s5127_s28 = smov [#allocation5]  }
  0x3c   : > { %p5053_p10 = scmp.ne.s32.totalorder %s215_s20, %s5052_s25  ;;  %s5057_s29 = sshll.u32 %s5127_s28, 4  ;;  %s5058_s29 = int_to_ptr.vmem [resolvable:$false] %s5057_s29 }
  0x3d   : > { %s5059_s4 = scalar_lea.vmem %s5058_s29, 256  ;;  %p5060_p7 = scmp.lt.s32.totalorder %s215_s20, %s5058_s29 }
  0x3e   : > { %p5055_p5 = pnand %p5053_p10, %p5009_p12  ;;  %p5061_p4 = scmp.lt.s32.totalorder %s5059_s4, %s5052_s25 }
  0x40   : > { %p5056_p6 = pneg %p5055_p5  ;;  %p5062_p11 = por %p5061_p4, %p5060_p7 }
  0x42   : > { %p5063_p13 = pnand %p5062_p11, %p5056_p6 }
  0x44   : > { %5066 = shalt.err (!%p5063_p13)
}
  0x45   : > { %4951 = dma.hbm_to_vmem [thread:$0]  (!%p5213_p9), %s5260_s12, 128, %s215_s20, %s203_s30  }
  0x46   : > { %p5950_p8 = scmp.ne.s32.totalorder %s5949_s9, 0 }
  0x47   : > { %s225_s8 = sand.u32 (!%p5950_p8), 1, %s5105_s13   ;;  %p5951_p12 = scmp.ne.s32.totalorder (!%p5950_p8), %s5946_s23, 0 }
  0x48   : > { %223 = sbr.rel (%p5950_p8) target bundleno = 823 (0x337), region = 32  ;;  %s4373_s10 = sshll.u32 (!%p5950_p8), %s225_s8, 12 }
  0x49   : > { %s226_s11 = scalar_lea.sflag (!%p5950_p8), [#allocation4], %s225_s8  ;;  %s5285_s18 = scalar_lea.vmem (!%p5950_p8), [#allocation3], %s4373_s10 }
  0x4f   : > { %5092 = dma.done.wait (%p5951_p12), %s226_s11, 65536  }
  0x50   : > { %5094 = vsyncadd (%p5951_p12), %s226_s11, 4294901760  ;;  %s4374_s5 = sshll.u32 %s225_s8, 3  ;;  %s235_s6 = scalar_lea.sflag [#allocation6], %s225_s8 }
  0x51   : > { %s5291_s7 = scalar_lea.vmem [#allocation5], %s4374_s5 }
  0x52   : > { %5096 = dma.done.wait (%p5951_p12), %s235_s6, 128  }
  0x53   : > { %5098 = vsyncadd (%p5951_p12), %s235_s6, 4294967168  ;;  %v309_v0 = vld [vmem:[%s5285_s18] sm:$0xff]  ;;  %v310_v2 = vld [vmem:[%s5285_s18 + $0x8] sm:$0xff]  ;;  %v5128_v32 = vmov 1966171168   ;;  %v826_v34 = vlaneseq  ;;  %s4375_s12 = sshll.u32 %s5113_s15, 2 }
  0x54   : > { %v313_v1 = vld [vmem:[%s5285_s18 + $0x20] sm:$0xff]  ;;  %v314_v4 = vld [vmem:[%s5285_s18 + $0x28] sm:$0xff]  ;;  %v824_v33 = vunpack.c.l.s4 %v5128_v32  ;;  %p293_p7 = scmp.lt.s32.totalorder %s4375_s12, 7 }
  0x55   : > { %v4378_v3 = vcombine.high %v309_v0, %v313_v1  ;;  %v4377_v5 = vcombine.low %v309_v0, %v313_v1  ;;  %v317_v6 = vld [vmem:[%s5285_s18 + $0x40] sm:$0xff]  ;;  %v4380_v8 = vcombine.high %v310_v2, %v314_v4  ;;  %v4379_v9 = vcombine.low %v310_v2, %v314_v4  ;;  %v318_v11 = vld [vmem:[%s5285_s18 + $0x48] sm:$0xff] }
  0x56   : > { %v321_v7 = vld [vmem:[%s5285_s18 + $0x60] sm:$0xff]  ;;  %v322_v12 = vld [vmem:[%s5285_s18 + $0x68] sm:$0xff]  ;;  %v825_v43 = vunpack.c.0.s8 %v824_v33  ;;  %v5319_v44 = vshrl.u32 %v826_v34, 7  ;;  %s5960_s12 = smov (!%p293_p7, %s4375_s12), 7 }
  0x57   : > { %v4386_v10 = vcombine.high %v317_v6, %v321_v7  ;;  %v325_v13 = vld [vmem:[%s5285_s18 + $0x80] sm:$0xff]  ;;  %3439 = vmatprep.subr.bf16.mxu0 %v4378_v3  ;;  %v4388_v14 = vcombine.high %v318_v11, %v322_v12  ;;  %v326_v16 = vld [vmem:[%s5285_s18 + $0x88] sm:$0xff]  ;;  %3603 = vmatprep.subr.bf16.mxu1 %v4380_v8  ;;  %v4385_v18 = vcombine.low %v317_v6, %v321_v7  ;;  %s4376_s15 = sshll.u32 %s5960_s12, 1 }
  0x58   : > { %v329_v15 = vld [vmem:[%s5285_s18 + $0xa0] sm:$0xff]  ;;  %v330_v17 = vld [vmem:[%s5285_s18 + $0xa8] sm:$0xff]  ;;  %3440 = vmatpush1.bf16.msra.mxu0 %v4377_v5  ;;  %3604 = vmatpush1.bf16.msra.mxu1 %v4379_v9  ;;  %v4387_v19 = vcombine.low %v318_v11, %v322_v12  ;;  %v5326_v53 = vsub.s32 %v825_v43, %v5319_v44  ;;  %s298_s21 = scalar_lea.vmem %s5943_s3, %s4376_s15 }
  0x59   : > { %3441 = vmatprep.subr.bf16.mxu0 %v4386_v10  ;;  %v4394_v20 = vcombine.high %v325_v13, %v329_v15  ;;  %3605 = vmatprep.subr.bf16.mxu1 %v4388_v14  ;;  %v4396_v21 = vcombine.high %v326_v16, %v330_v17  ;;  %v333_v22 = vld [vmem:[%s5285_s18 + $0xc0] sm:$0xff]  ;;  %v334_v24 = vld [vmem:[%s5285_s18 + $0xc8] sm:$0xff]  ;;  %v4393_v26 = vcombine.low %v325_v13, %v329_v15 }
  0x5a   : > { %v337_v23 = vld [vmem:[%s5285_s18 + $0xe0] sm:$0xff]  ;;  %v338_v25 = vld [vmem:[%s5285_s18 + $0xe8] sm:$0xff]  ;;  %v4395_v27 = vcombine.low %v326_v16, %v330_v17 }
  0x5b   : > { %v4402_v28 = vcombine.high %v333_v22, %v337_v23  ;;  %v4404_v29 = vcombine.high %v334_v24, %v338_v25  ;;  %v341_v30 = vld [vmem:[%s5285_s18 + $0x100] sm:$0xff]  ;;  %v342_v35 = vld [vmem:[%s5285_s18 + $0x108] sm:$0xff]  ;;  %v4401_v37 = vcombine.low %v333_v22, %v337_v23  ;;  %v4403_v38 = vcombine.low %v334_v24, %v338_v25 }
  0x5c   : > { %3442 = vmatpush1.bf16.msra.mxu0 %v4385_v18  ;;  %3606 = vmatpush1.bf16.msra.mxu1 %v4387_v19  ;;  %v345_v31 = vld [vmem:[%s5285_s18 + $0x120] sm:$0xff]  ;;  %v346_v36 = vld [vmem:[%s5285_s18 + $0x128] sm:$0xff] }
  0x5d   : > { %3443 = vmatprep.subr.bf16.mxu0 %v4394_v20  ;;  %3607 = vmatprep.subr.bf16.mxu1 %v4396_v21  ;;  %v4410_v39 = vcombine.high %v341_v30, %v345_v31  ;;  %v4412_v40 = vcombine.high %v342_v35, %v346_v36  ;;  %v349_v41 = vld [vmem:[%s5285_s18 + $0x140] sm:$0xff]  ;;  %v350_v45 = vld [vmem:[%s5285_s18 + $0x148] sm:$0xff]  ;;  %v4409_v47 = vcombine.low %v341_v30, %v345_v31 }
  0x5e   : > { %v353_v42 = vld [vmem:[%s5285_s18 + $0x160] sm:$0xff]  ;;  %v354_v46 = vld [vmem:[%s5285_s18 + $0x168] sm:$0xff]  ;;  %v4411_v48 = vcombine.low %v342_v35, %v346_v36 }
  0x5f   : > { %v4418_v49 = vcombine.high %v349_v41, %v353_v42  ;;  %v4420_v50 = vcombine.high %v350_v45, %v354_v46  ;;  %v357_v51 = vld [vmem:[%s5285_s18 + $0x180] sm:$0xff]  ;;  %v358_v54 = vld [vmem:[%s5285_s18 + $0x188] sm:$0xff]  ;;  %v4417_v56 = vcombine.low %v349_v41, %v353_v42  ;;  %v4419_v57 = vcombine.low %v350_v45, %v354_v46 }
  0x60   : > { %3444 = vmatpush1.bf16.msra.mxu0 %v4393_v26  ;;  %3608 = vmatpush1.bf16.msra.mxu1 %v4395_v27  ;;  %v361_v52 = vld [vmem:[%s5285_s18 + $0x1a0] sm:$0xff]  ;;  %v362_v55 = vld [vmem:[%s5285_s18 + $0x1a8] sm:$0xff] }
  0x61   : > { %3445 = vmatprep.subr.bf16.mxu0 %v4402_v28  ;;  %3609 = vmatprep.subr.bf16.mxu1 %v4404_v29  ;;  %v4426_v58 = vcombine.high %v357_v51, %v361_v52  ;;  %v5333_v59 = vld [vmem:[%s5940_s0] sm:$0xff]  ;;  %v4428_v60 = vcombine.high %v358_v54, %v362_v55  ;;  %v366_v0 = vld [vmem:[%s5285_s18 + $0x1c8] sm:$0xff]  ;;  %v4425_v2 = vcombine.low %v357_v51, %v361_v52 }
  0x62   : > { %v365_v61 = vld [vmem:[%s5285_s18 + $0x1c0] sm:$0xff]  ;;  %v5339_v63 = vrot.slane %v5333_v59, %v5326_v53  ;;  %v370_v1 = vld [vmem:[%s5285_s18 + $0x1e8] sm:$0xff]  ;;  %v4427_v4 = vcombine.low %v358_v54, %v362_v55 }
  0x63   : > { %v369_v62 = vld [vmem:[%s5285_s18 + $0x1e0] sm:$0xff]  ;;  %v4436_v6 = vcombine.high %v366_v0, %v370_v1  ;;  %v374_v10 = vld [vmem:[%s5285_s18 + $0x208] sm:$0xff]  ;;  %v4435_v13 = vcombine.low %v366_v0, %v370_v1 }
  0x64   : > { %3446 = vmatpush1.bf16.msra.mxu0 %v4401_v37  ;;  %3610 = vmatpush1.bf16.msra.mxu1 %v4403_v38  ;;  %v837_v3 = vcombine.high %v5339_v63, %v5339_v63  ;;  %v4434_v5 = vcombine.high %v365_v61, %v369_v62  ;;  %v373_v7 = vld [vmem:[%s5285_s18 + $0x200] sm:$0xff]  ;;  %v378_v11 = vld [vmem:[%s5285_s18 + $0x228] sm:$0xff]  ;;  %v4433_v12 = vcombine.low %v365_v61, %v369_v62 }
  0x65   : > { %3447 = vmatprep.subr.bf16.mxu0 %v4410_v39  ;;  %3611 = vmatprep.subr.bf16.mxu1 %v4412_v40  ;;  %v377_v8 = vld [vmem:[%s5285_s18 + $0x220] sm:$0xff]  ;;  %v4444_v15 = vcombine.high %v374_v10, %v378_v11  ;;  %v382_v18 = vld [vmem:[%s5285_s18 + $0x248] sm:$0xff]  ;;  %v4443_v21 = vcombine.low %v374_v10, %v378_v11 }
  0x66   : > { %v5348_v9 = vrot.slane %v837_v3, %v5326_v53  ;;  %v4442_v14 = vcombine.high %v373_v7, %v377_v8  ;;  %v381_v16 = vld [vmem:[%s5285_s18 + $0x240] sm:$0xff]  ;;  %v386_v19 = vld [vmem:[%s5285_s18 + $0x268] sm:$0xff]  ;;  %v4441_v20 = vcombine.low %v373_v7, %v377_v8 }
  0x67   : > { %v385_v17 = vld [vmem:[%s5285_s18 + $0x260] sm:$0xff]  ;;  %v4452_v23 = vcombine.high %v382_v18, %v386_v19  ;;  %v390_v26 = vld [vmem:[%s5285_s18 + $0x288] sm:$0xff]  ;;  %v4451_v29 = vcombine.low %v382_v18, %v386_v19  ;;  %v822_v18 = vcombine.high %v5333_v59, %v5333_v59 }
  0x68   : > { %3448 = vmatpush1.bf16.msra.mxu0 %v4409_v47  ;;  %3612 = vmatpush1.bf16.msra.mxu1 %v4411_v48  ;;  %v4450_v22 = vcombine.high %v381_v16, %v385_v17  ;;  %v389_v24 = vld [vmem:[%s5285_s18 + $0x280] sm:$0xff]  ;;  %v394_v27 = vld [vmem:[%s5285_s18 + $0x2a8] sm:$0xff]  ;;  %v4449_v28 = vcombine.low %v381_v16, %v385_v17 }
  0x69   : > { %3449 = vmatprep.subr.bf16.mxu0 %v4418_v49  ;;  %3613 = vmatprep.subr.bf16.mxu1 %v4420_v50  ;;  %v393_v25 = vld [vmem:[%s5285_s18 + $0x2a0] sm:$0xff]  ;;  %v4460_v31 = vcombine.high %v390_v26, %v394_v27  ;;  %v398_v34 = vld [vmem:[%s5285_s18 + $0x2c8] sm:$0xff]  ;;  %v4459_v37 = vcombine.low %v390_v26, %v394_v27 }
  0x6a   : > { %3471 = vmatprep.mubr.bf16.mxu0 %v5348_v9  ;;  %3635 = vmatprep.mubr.bf16.mxu1 %v5348_v9  ;;  %v4458_v30 = vcombine.high %v389_v24, %v393_v25  ;;  %v397_v32 = vld [vmem:[%s5285_s18 + $0x2c0] sm:$0xff]  ;;  %v402_v35 = vld [vmem:[%s5285_s18 + $0x2e8] sm:$0xff]  ;;  %v4457_v36 = vcombine.low %v389_v24, %v393_v25  ;;  %v836_v24 = vrot.slane %v822_v18, %v5326_v53 }
  0x6b   : > { %v401_v33 = vld [vmem:[%s5285_s18 + $0x2e0] sm:$0xff]  ;;  %v4468_v39 = vcombine.high %v398_v34, %v402_v35  ;;  %v406_v42 = vld [vmem:[%s5285_s18 + $0x308] sm:$0xff]  ;;  %v4467_v46 = vcombine.low %v398_v34, %v402_v35  ;;  %v5393_v25 = vrot.slane %v5339_v63, %v5326_v53  ;;  %v5401_v63 = vcombine.high %v5348_v9, %v5348_v9 }
  0x6c   : > { %3450 = vmatpush1.bf16.msra.mxu0 %v4417_v56  ;;  %3614 = vmatpush1.bf16.msra.mxu1 %v4419_v57  ;;  %v4466_v38 = vcombine.high %v397_v32, %v401_v33  ;;  %v405_v40 = vld [vmem:[%s5285_s18 + $0x300] sm:$0xff]  ;;  %v410_v43 = vld [vmem:[%s5285_s18 + $0x328] sm:$0xff]  ;;  %v4465_v45 = vcombine.low %v397_v32, %v401_v33  ;;  %v5407_v35 = vrot.slane %v836_v24, %v5326_v53 }
  0x6d   : > { %3451 = vmatprep.subr.bf16.mxu0 %v4426_v58  ;;  %3615 = vmatprep.subr.bf16.mxu1 %v4428_v60  ;;  %v409_v41 = vld [vmem:[%s5285_s18 + $0x320] sm:$0xff]  ;;  %v4476_v48 = vcombine.high %v406_v42, %v410_v43  ;;  %v414_v51 = vld [vmem:[%s5285_s18 + $0x348] sm:$0xff]  ;;  %v4475_v55 = vcombine.low %v406_v42, %v410_v43 }
  0x6e   : > { %v4474_v47 = vcombine.high %v405_v40, %v409_v41  ;;  %v413_v49 = vld [vmem:[%s5285_s18 + $0x340] sm:$0xff]  ;;  %v418_v52 = vld [vmem:[%s5285_s18 + $0x368] sm:$0xff]  ;;  %v4473_v54 = vcombine.low %v405_v40, %v409_v41 }
  0x6f   : > { %v417_v50 = vld [vmem:[%s5285_s18 + $0x360] sm:$0xff]  ;;  %v4484_v57 = vcombine.high %v414_v51, %v418_v52  ;;  %v422_v61 = vld [vmem:[%s5285_s18 + $0x388] sm:$0xff]  ;;  %v4483_v1 = vcombine.low %v414_v51, %v418_v52 }
  0x70   : > { %3452 = vmatpush1.bf16.msra.mxu0 %v4425_v2  ;;  %3616 = vmatpush1.bf16.msra.mxu1 %v4427_v4  ;;  %v4482_v56 = vcombine.high %v413_v49, %v417_v50  ;;  %v421_v58 = vld [vmem:[%s5285_s18 + $0x380] sm:$0xff]  ;;  %v426_v62 = vld [vmem:[%s5285_s18 + $0x3a8] sm:$0xff]  ;;  %v4481_v0 = vcombine.low %v413_v49, %v417_v50 }
  0x71   : > { %3453 = vmatprep.subr.bf16.mxu0 %v4434_v5  ;;  %3617 = vmatprep.subr.bf16.mxu1 %v4436_v6  ;;  %v425_v60 = vld [vmem:[%s5285_s18 + $0x3a0] sm:$0xff]  ;;  %v4492_v3 = vcombine.high %v422_v61, %v426_v62  ;;  %v430_v6 = vld [vmem:[%s5285_s18 + $0x3c8] sm:$0xff]  ;;  %v4491_v10 = vcombine.low %v422_v61, %v426_v62 }
  0x72   : > { %v4490_v2 = vcombine.high %v421_v58, %v425_v60  ;;  %v429_v4 = vld [vmem:[%s5285_s18 + $0x3c0] sm:$0xff]  ;;  %v434_v7 = vld [vmem:[%s5285_s18 + $0x3e8] sm:$0xff]  ;;  %v4489_v8 = vcombine.low %v421_v58, %v425_v60 }
  0x73   : > { %v433_v5 = vld [vmem:[%s5285_s18 + $0x3e0] sm:$0xff]  ;;  %v442_v16 = vld [vmem:[%s5285_s18 + $0x428] sm:$0xff]  ;;  %v4499_v19 = vcombine.low %v430_v6, %v434_v7 }
  0x74   : > { %3454 = vmatpush1.bf16.msra.mxu0 %v4433_v12  ;;  %3618 = vmatpush1.bf16.msra.mxu1 %v4435_v13  ;;  %v4498_v11 = vcombine.high %v429_v4, %v433_v5  ;;  %v4500_v12 = vcombine.high %v430_v6, %v434_v7  ;;  %v437_v13 = vld [vmem:[%s5285_s18 + $0x400] sm:$0xff]  ;;  %v4497_v17 = vcombine.low %v429_v4, %v433_v5  ;;  %v446_v26 = vld [vmem:[%s5285_s18 + $0x448] sm:$0xff] }
  0x75   : > { %3455 = vmatprep.subr.bf16.mxu0 %v4442_v14  ;;  %3619 = vmatprep.subr.bf16.mxu1 %v4444_v15  ;;  %v441_v14 = vld [vmem:[%s5285_s18 + $0x420] sm:$0xff]  ;;  %v438_v15 = vld [vmem:[%s5285_s18 + $0x408] sm:$0xff] }
  0x76   : > { %v450_v27 = vld [vmem:[%s5285_s18 + $0x468] sm:$0xff]  ;;  %v4505_v59 = vcombine.low %v437_v13, %v441_v14  ;;  %v453_v32 = vld [vmem:[%s5285_s18 + $0x480] sm:$0xff] }
  0x77   : > { %v457_v33 = vld [vmem:[%s5285_s18 + $0x4a0] sm:$0xff]  ;;  %v462_v43 = vld [vmem:[%s5285_s18 + $0x4c8] sm:$0xff] }
  0x78   : > { %3456 = vmatpush1.bf16.msra.mxu0 %v4441_v20  ;;  %3620 = vmatpush1.bf16.msra.mxu1 %v4443_v21  ;;  %v4506_v20 = vcombine.high %v437_v13, %v441_v14  ;;  %v4508_v21 = vcombine.high %v438_v15, %v442_v16  ;;  %v4522_v40 = vcombine.high %v453_v32, %v457_v33  ;;  %v465_v42 = vld [vmem:[%s5285_s18 + $0x4e0] sm:$0xff]  ;;  %v470_v52 = vld [vmem:[%s5285_s18 + $0x508] sm:$0xff] }
  0x79   : > { %3457 = vmatprep.subr.bf16.mxu0 %v4450_v22  ;;  %3621 = vmatprep.subr.bf16.mxu1 %v4452_v23  ;;  %v445_v22 = vld [vmem:[%s5285_s18 + $0x440] sm:$0xff]  ;;  %v478_v62 = vld [vmem:[%s5285_s18 + $0x548] sm:$0xff] }
  0x7a   : > { %v449_v23 = vld [vmem:[%s5285_s18 + $0x460] sm:$0xff]  ;;  %v486_v7 = vld [vmem:[%s5285_s18 + $0x588] sm:$0xff] }
  0x7b   : > { %v469_v50 = vld [vmem:[%s5285_s18 + $0x500] sm:$0xff] }
  0x7c   : > { %3458 = vmatpush1.bf16.msra.mxu0 %v4449_v28  ;;  %3622 = vmatpush1.bf16.msra.mxu1 %v4451_v29  ;;  %v838_v28 = vcombine.high %v836_v24, %v836_v24  ;;  %v4507_v29 = vcombine.low %v438_v15, %v442_v16  ;;  %v473_v51 = vld [vmem:[%s5285_s18 + $0x520] sm:$0xff]  ;;  %v494_v16 = vld [vmem:[%s5285_s18 + $0x5c8] sm:$0xff] }
  0x7d   : > { %3459 = vmatprep.subr.bf16.mxu0 %v4458_v30  ;;  %3623 = vmatprep.subr.bf16.mxu1 %v4460_v31  ;;  %v4514_v30 = vcombine.high %v445_v22, %v449_v23  ;;  %v4516_v31 = vcombine.high %v446_v26, %v450_v27  ;;  %v477_v60 = vld [vmem:[%s5285_s18 + $0x540] sm:$0xff]  ;;  %v502_v24 = vld [vmem:[%s5285_s18 + $0x608] sm:$0xff] }
  0x7e   : > { %v5404_v34 = vrot.slane %v838_v28, %v5326_v53  ;;  %v461_v53 = vld [vmem:[%s5285_s18 + $0x4c0] sm:$0xff] }
  0x7f   : > { %v481_v61 = vld [vmem:[%s5285_s18 + $0x560] sm:$0xff] }
  0x80   : > { %3460 = vmatpush1.bf16.msra.mxu0 %v4457_v36  ;;  %3624 = vmatpush1.bf16.msra.mxu1 %v4459_v37  ;;  %v454_v36 = vld [vmem:[%s5285_s18 + $0x488] sm:$0xff]  ;;  %v485_v5 = vld [vmem:[%s5285_s18 + $0x580] sm:$0xff] }
  0x81   : > { %3461 = vmatprep.subr.bf16.mxu0 %v4466_v38  ;;  %3625 = vmatprep.subr.bf16.mxu1 %v4468_v39  ;;  %v458_v37 = vld [vmem:[%s5285_s18 + $0x4a8] sm:$0xff]  ;;  %v4513_v38 = vcombine.low %v445_v22, %v449_v23  ;;  %v4515_v39 = vcombine.low %v446_v26, %v450_v27  ;;  %v489_v6 = vld [vmem:[%s5285_s18 + $0x5a0] sm:$0xff] }
  0x82   : > { %v4524_v41 = vcombine.high %v454_v36, %v458_v37  ;;  %v493_v14 = vld [vmem:[%s5285_s18 + $0x5c0] sm:$0xff]  ;;  %v4553_v18 = vcombine.low %v485_v5, %v489_v6  ;;  %v506_v26 = vld [vmem:[%s5285_s18 + $0x628] sm:$0xff] }
  0x83   : > { %v497_v15 = vld [vmem:[%s5285_s18 + $0x5e0] sm:$0xff] }
  0x84   : > { %3462 = vmatpush1.bf16.msra.mxu0 %v4465_v45  ;;  %3626 = vmatpush1.bf16.msra.mxu1 %v4467_v46  ;;  %v466_v45 = vld [vmem:[%s5285_s18 + $0x4e8] sm:$0xff]  ;;  %v4521_v46 = vcombine.low %v453_v32, %v457_v33  ;;  %v501_v22 = vld [vmem:[%s5285_s18 + $0x600] sm:$0xff]  ;;  %v4561_v27 = vcombine.low %v493_v14, %v497_v15 }
  0x85   : > { %3463 = vmatprep.subr.bf16.mxu0 %v4474_v47  ;;  %3627 = vmatprep.subr.bf16.mxu1 %v4476_v48  ;;  %v4523_v47 = vcombine.low %v454_v36, %v458_v37  ;;  %v4530_v48 = vcombine.high %v461_v53, %v465_v42  ;;  %v4532_v49 = vcombine.high %v462_v43, %v466_v45  ;;  %v505_v23 = vld [vmem:[%s5285_s18 + $0x620] sm:$0xff]  ;;  %v510_v32 = vld [vmem:[%s5285_s18 + $0x648] sm:$0xff] }
  0x86   : > { %v4570_v28 = vcombine.high %v501_v22, %v505_v23  ;;  %v514_v33 = vld [vmem:[%s5285_s18 + $0x668] sm:$0xff]  ;;  %v4569_v36 = vcombine.low %v501_v22, %v505_v23  ;;  %v4571_v37 = vcombine.low %v502_v24, %v506_v26 }
  0x87   : > { %v558_v22 = vld [vmem:[%s5285_s18 + $0x7c8] sm:$0xff] }
  0x88   : > { %3464 = vmatpush1.bf16.msra.mxu0 %v4473_v54  ;;  %3628 = vmatpush1.bf16.msra.mxu1 %v4475_v55  ;;  %v474_v54 = vld [vmem:[%s5285_s18 + $0x528] sm:$0xff]  ;;  %v4529_v55 = vcombine.low %v461_v53, %v465_v42 }
  0x89   : > { %3465 = vmatprep.subr.bf16.mxu0 %v4482_v56  ;;  %3629 = vmatprep.subr.bf16.mxu1 %v4484_v57  ;;  %v4531_v56 = vcombine.low %v462_v43, %v466_v45  ;;  %v4538_v57 = vcombine.high %v469_v50, %v473_v51  ;;  %v4540_v58 = vcombine.high %v470_v52, %v474_v54  ;;  %v518_v53 = vld [vmem:[%s5285_s18 + $0x688] sm:$0xff] }
  0x8a   : > { %v522_v42 = vld [vmem:[%s5285_s18 + $0x6a8] sm:$0xff]  ;;  %v4579_v45 = vcombine.low %v510_v32, %v514_v33 }
  0x8b   : > { %v562_v23 = vld [vmem:[%s5285_s18 + $0x7e8] sm:$0xff] }
  0x8c   : > { %3466 = vmatpush1.bf16.msra.mxu0 %v4481_v0  ;;  %3630 = vmatpush1.bf16.msra.mxu1 %v4483_v1  ;;  %v482_v0 = vld [vmem:[%s5285_s18 + $0x568] sm:$0xff]  ;;  %v4537_v1 = vcombine.low %v469_v50, %v473_v51 }
  0x8d   : > { %3467 = vmatprep.subr.bf16.mxu0 %v4490_v2  ;;  %3631 = vmatprep.subr.bf16.mxu1 %v4492_v3  ;;  %v4539_v2 = vcombine.low %v470_v52, %v474_v54  ;;  %v4546_v3 = vcombine.high %v477_v60, %v481_v61  ;;  %v4548_v4 = vcombine.high %v478_v62, %v482_v0  ;;  %v526_v50 = vld [vmem:[%s5285_s18 + $0x6c8] sm:$0xff] }
  0x8e   : > { %v530_v51 = vld [vmem:[%s5285_s18 + $0x6e8] sm:$0xff]  ;;  %v4587_v54 = vcombine.low %v518_v53, %v522_v42 }
  0x90   : > { %3468 = vmatpush1.bf16.msra.mxu0 %v4489_v8  ;;  %3632 = vmatpush1.bf16.msra.mxu1 %v4491_v10  ;;  %v490_v8 = vld [vmem:[%s5285_s18 + $0x5a8] sm:$0xff]  ;;  %v4545_v10 = vcombine.low %v477_v60, %v481_v61 }
  0x91   : > { %3469 = vmatprep.subr.bf16.mxu0 %v4498_v11  ;;  %3633 = vmatprep.subr.bf16.mxu1 %v4500_v12  ;;  %v4547_v11 = vcombine.low %v478_v62, %v482_v0  ;;  %v4554_v12 = vcombine.high %v485_v5, %v489_v6  ;;  %v4556_v13 = vcombine.high %v486_v7, %v490_v8  ;;  %v534_v60 = vld [vmem:[%s5285_s18 + $0x708] sm:$0xff] }
  0x92   : > { %v538_v61 = vld [vmem:[%s5285_s18 + $0x728] sm:$0xff]  ;;  %v4595_v0 = vcombine.low %v526_v50, %v530_v51 }
  0x93   : > { %v542_v5 = vld [vmem:[%s5285_s18 + $0x748] sm:$0xff] }
  0x94   : > { %3470 = vmatpush1.bf16.msra.mxu0 %v4497_v17  ;;  %3634 = vmatpush1.bf16.msra.mxu1 %v4499_v19  ;;  %v498_v17 = vld [vmem:[%s5285_s18 + $0x5e8] sm:$0xff]  ;;  %v4555_v19 = vcombine.low %v486_v7, %v490_v8  ;;  %v4603_v8 = vcombine.low %v534_v60, %v538_v61 }
  0x95   : > { %3480 = vmatprep.subr.bf16.mxu0 %v4506_v20  ;;  %3644 = vmatprep.subr.bf16.mxu1 %v4508_v21  ;;  %v4562_v20 = vcombine.high %v493_v14, %v497_v15  ;;  %v4564_v21 = vcombine.high %v494_v16, %v498_v17  ;;  %v546_v6 = vld [vmem:[%s5285_s18 + $0x768] sm:$0xff] }
  0x96   : > { %v550_v14 = vld [vmem:[%s5285_s18 + $0x788] sm:$0xff] }
  0x97   : > { %3472 = vmatmul.mubr.bf16.vlgmr.msra.gmra.mrb[0].mxu0 %v5393_v25  ;;  %3636 = vmatmul.mubr.bf16.vlgmr.msra.gmra.mrb[0].mxu1 %v5393_v25  ;;  %v554_v15 = vld [vmem:[%s5285_s18 + $0x7a8] sm:$0xff] }
  0x98   : > { %3481 = vmatpush1.bf16.msra.mxu0 %v4505_v59  ;;  %3645 = vmatpush1.bf16.msra.mxu1 %v4507_v29  ;;  %v4563_v59 = vcombine.low %v494_v16, %v498_v17  ;;  %v4572_v29 = vcombine.high %v502_v24, %v506_v26  ;;  %v4611_v17 = vcombine.low %v542_v5, %v546_v6 }
  0x99   : > { %3482 = vmatprep.subr.bf16.mxu0 %v4514_v30  ;;  %3646 = vmatprep.subr.bf16.mxu1 %v4516_v31  ;;  %v509_v30 = vld [vmem:[%s5285_s18 + $0x640] sm:$0xff]  ;;  %v4619_v26 = vcombine.low %v550_v14, %v554_v15 }
  0x9a   : > { %3512 = vmatprep.mubr.bf16.mxu0 %v5401_v63  ;;  %3676 = vmatprep.mubr.bf16.mxu1 %v5401_v63  ;;  %v513_v31 = vld [vmem:[%s5285_s18 + $0x660] sm:$0xff] }
  0x9b   : > { %v4577_v43 = vcombine.low %v509_v30, %v513_v31 }
  0x9c   : > { %3483 = vmatpush1.bf16.msra.mxu0 %v4513_v38  ;;  %3647 = vmatpush1.bf16.msra.mxu1 %v4515_v39  ;;  %v4578_v38 = vcombine.high %v509_v30, %v513_v31  ;;  %v4580_v39 = vcombine.high %v510_v32, %v514_v33  ;;  %v566_v30 = vld [vmem:[%s5285_s18 + $0x808] sm:$0xff]  ;;  %v4627_v33 = vcombine.low %v558_v22, %v562_v23 }
  0x9d   : > { %3484 = vmatprep.subr.bf16.mxu0 %v4522_v40  ;;  %3648 = vmatprep.subr.bf16.mxu1 %v4524_v41  ;;  %v517_v40 = vld [vmem:[%s5285_s18 + $0x680] sm:$0xff]  ;;  %v570_v31 = vld [vmem:[%s5285_s18 + $0x828] sm:$0xff] }
  0x9e   : > { %v521_v41 = vld [vmem:[%s5285_s18 + $0x6a0] sm:$0xff] }
  0x9f   : > { %v4585_v52 = vcombine.low %v517_v40, %v521_v41 }
  0xa0   : > { %3485 = vmatpush1.bf16.msra.mxu0 %v4521_v46  ;;  %3649 = vmatpush1.bf16.msra.mxu1 %v4523_v47  ;;  %v4586_v46 = vcombine.high %v517_v40, %v521_v41  ;;  %v4588_v47 = vcombine.high %v518_v53, %v522_v42  ;;  %v5475_v40 = vcombine.high %v5393_v25, %v5393_v25  ;;  %v574_v41 = vld [vmem:[%s5285_s18 + $0x848] sm:$0xff] }
  0xa1   : > { %3486 = vmatprep.subr.bf16.mxu0 %v4530_v48  ;;  %3650 = vmatprep.subr.bf16.mxu1 %v4532_v49  ;;  %v525_v48 = vld [vmem:[%s5285_s18 + $0x6c0] sm:$0xff]  ;;  %v578_v53 = vld [vmem:[%s5285_s18 + $0x868] sm:$0xff] }
  0xa2   : > { %v529_v49 = vld [vmem:[%s5285_s18 + $0x6e0] sm:$0xff] }
  0xa3   : > { %v4593_v62 = vcombine.low %v525_v48, %v529_v49 }
  0xa4   : > { %3487 = vmatpush1.bf16.msra.mxu0 %v4529_v55  ;;  %3651 = vmatpush1.bf16.msra.mxu1 %v4531_v56  ;;  %v4594_v55 = vcombine.high %v525_v48, %v529_v49  ;;  %v4596_v56 = vcombine.high %v526_v50, %v530_v51  ;;  %v585_v48 = vld [vmem:[%s5285_s18 + $0x8a0] sm:$0xff]  ;;  %v582_v49 = vld [vmem:[%s5285_s18 + $0x888] sm:$0xff] }
  0xa5   : > { %3488 = vmatprep.subr.bf16.mxu0 %v4538_v57  ;;  %3652 = vmatprep.subr.bf16.mxu1 %v4540_v58  ;;  %v533_v57 = vld [vmem:[%s5285_s18 + $0x700] sm:$0xff]  ;;  %v586_v50 = vld [vmem:[%s5285_s18 + $0x8a8] sm:$0xff] }
  0xa6   : > { %v537_v58 = vld [vmem:[%s5285_s18 + $0x720] sm:$0xff] }
  0xa7   : > { %v4601_v7 = vcombine.low %v533_v57, %v537_v58 }
  0xa8   : > { %3489 = vmatpush1.bf16.msra.mxu0 %v4537_v1  ;;  %3653 = vmatpush1.bf16.msra.mxu1 %v4539_v2  ;;  %v4602_v1 = vcombine.high %v533_v57, %v537_v58  ;;  %v4604_v2 = vcombine.high %v534_v60, %v538_v61  ;;  %v593_v57 = vld [vmem:[%s5285_s18 + $0x8e0] sm:$0xff]  ;;  %v590_v58 = vld [vmem:[%s5285_s18 + $0x8c8] sm:$0xff] }
  0xa9   : > { %3490 = vmatprep.subr.bf16.mxu0 %v4546_v3  ;;  %3654 = vmatprep.subr.bf16.mxu1 %v4548_v4  ;;  %v541_v3 = vld [vmem:[%s5285_s18 + $0x740] sm:$0xff]  ;;  %v594_v60 = vld [vmem:[%s5285_s18 + $0x8e8] sm:$0xff] }
  0xaa   : > { %v545_v4 = vld [vmem:[%s5285_s18 + $0x760] sm:$0xff] }
  0xab   : > { %v4609_v16 = vcombine.low %v541_v3, %v545_v4 }
  0xac   : > { %3491 = vmatpush1.bf16.msra.mxu0 %v4545_v10  ;;  %3655 = vmatpush1.bf16.msra.mxu1 %v4547_v11  ;;  %v4610_v10 = vcombine.high %v541_v3, %v545_v4  ;;  %v4612_v11 = vcombine.high %v542_v5, %v546_v6  ;;  %v601_v3 = vld [vmem:[%s5285_s18 + $0x920] sm:$0xff]  ;;  %v598_v4 = vld [vmem:[%s5285_s18 + $0x908] sm:$0xff] }
  0xad   : > { %3492 = vmatprep.subr.bf16.mxu0 %v4554_v12  ;;  %3656 = vmatprep.subr.bf16.mxu1 %v4556_v13  ;;  %v549_v12 = vld [vmem:[%s5285_s18 + $0x780] sm:$0xff]  ;;  %v602_v5 = vld [vmem:[%s5285_s18 + $0x928] sm:$0xff] }
  0xae   : > { %v553_v13 = vld [vmem:[%s5285_s18 + $0x7a0] sm:$0xff] }
  0xaf   : > { %v4617_v24 = vcombine.low %v549_v12, %v553_v13 }
  0xb0   : > { %3493 = vmatpush1.bf16.msra.mxu0 %v4553_v18  ;;  %3657 = vmatpush1.bf16.msra.mxu1 %v4555_v19  ;;  %v4618_v18 = vcombine.high %v549_v12, %v553_v13  ;;  %v4620_v19 = vcombine.high %v550_v14, %v554_v15  ;;  %v609_v12 = vld [vmem:[%s5285_s18 + $0x960] sm:$0xff]  ;;  %v606_v13 = vld [vmem:[%s5285_s18 + $0x948] sm:$0xff] }
  0xb1   : > { %3494 = vmatprep.subr.bf16.mxu0 %v4562_v20  ;;  %3658 = vmatprep.subr.bf16.mxu1 %v4564_v21  ;;  %v557_v20 = vld [vmem:[%s5285_s18 + $0x7c0] sm:$0xff]  ;;  %v610_v14 = vld [vmem:[%s5285_s18 + $0x968] sm:$0xff] }
  0xb2   : > { %v561_v21 = vld [vmem:[%s5285_s18 + $0x7e0] sm:$0xff] }
  0xb3   : > { %v4625_v32 = vcombine.low %v557_v20, %v561_v21 }
  0xb4   : > { %3495 = vmatpush1.bf16.msra.mxu0 %v4561_v27  ;;  %3659 = vmatpush1.bf16.msra.mxu1 %v4563_v59  ;;  %v4626_v27 = vcombine.high %v557_v20, %v561_v21  ;;  %v4628_v59 = vcombine.high %v558_v22, %v562_v23  ;;  %v617_v20 = vld [vmem:[%s5285_s18 + $0x9a0] sm:$0xff]  ;;  %v614_v21 = vld [vmem:[%s5285_s18 + $0x988] sm:$0xff] }
  0xb5   : > { %3496 = vmatprep.subr.bf16.mxu0 %v4570_v28  ;;  %3660 = vmatprep.subr.bf16.mxu1 %v4572_v29  ;;  %v565_v28 = vld [vmem:[%s5285_s18 + $0x800] sm:$0xff]  ;;  %v618_v22 = vld [vmem:[%s5285_s18 + $0x9a8] sm:$0xff] }
  0xb6   : > { %v569_v29 = vld [vmem:[%s5285_s18 + $0x820] sm:$0xff] }
  0xb7   : > { %v4633_v42 = vcombine.low %v565_v28, %v569_v29 }
  0xb8   : > { %3497 = vmatpush1.bf16.msra.mxu0 %v4569_v36  ;;  %3661 = vmatpush1.bf16.msra.mxu1 %v4571_v37  ;;  %v4634_v36 = vcombine.high %v565_v28, %v569_v29  ;;  %v4636_v37 = vcombine.high %v566_v30, %v570_v31  ;;  %v625_v28 = vld [vmem:[%s5285_s18 + $0x9e0] sm:$0xff]  ;;  %v622_v29 = vld [vmem:[%s5285_s18 + $0x9c8] sm:$0xff] }
  0xb9   : > { %3498 = vmatprep.subr.bf16.mxu0 %v4578_v38  ;;  %3662 = vmatprep.subr.bf16.mxu1 %v4580_v39  ;;  %v573_v38 = vld [vmem:[%s5285_s18 + $0x840] sm:$0xff] }
  0xba   : > { %v577_v39 = vld [vmem:[%s5285_s18 + $0x860] sm:$0xff] }
  0xbb   : > { %v4641_v51 = vcombine.low %v573_v38, %v577_v39 }
  0xbc   : > { %3499 = vmatpush1.bf16.msra.mxu0 %v4577_v43  ;;  %3663 = vmatpush1.bf16.msra.mxu1 %v4579_v45  ;;  %v4635_v43 = vcombine.low %v566_v30, %v570_v31  ;;  %v4642_v45 = vcombine.high %v573_v38, %v577_v39  ;;  %v626_v30 = vld [vmem:[%s5285_s18 + $0x9e8] sm:$0xff]  ;;  %v633_v38 = vld [vmem:[%s5285_s18 + $0xa20] sm:$0xff] }
  0xbd   : > { %3500 = vmatprep.subr.bf16.mxu0 %v4586_v46  ;;  %3664 = vmatprep.subr.bf16.mxu1 %v4588_v47  ;;  %v4644_v46 = vcombine.high %v574_v41, %v578_v53  ;;  %v581_v47 = vld [vmem:[%s5285_s18 + $0x880] sm:$0xff]  ;;  %v630_v39 = vld [vmem:[%s5285_s18 + $0xa08] sm:$0xff] }
  0xbe   : > { %v4649_v61 = vcombine.low %v581_v47, %v585_v48 }
  0xc0   : > { %3501 = vmatpush1.bf16.msra.mxu0 %v4585_v52  ;;  %3665 = vmatpush1.bf16.msra.mxu1 %v4587_v54  ;;  %v4643_v52 = vcombine.low %v574_v41, %v578_v53  ;;  %v4650_v54 = vcombine.high %v581_v47, %v585_v48  ;;  %v634_v41 = vld [vmem:[%s5285_s18 + $0xa28] sm:$0xff]  ;;  %v641_v47 = vld [vmem:[%s5285_s18 + $0xa60] sm:$0xff] }
  0xc1   : > { %3502 = vmatprep.subr.bf16.mxu0 %v4594_v55  ;;  %3666 = vmatprep.subr.bf16.mxu1 %v4596_v56  ;;  %v4652_v55 = vcombine.high %v582_v49, %v586_v50  ;;  %v589_v56 = vld [vmem:[%s5285_s18 + $0x8c0] sm:$0xff]  ;;  %v638_v48 = vld [vmem:[%s5285_s18 + $0xa48] sm:$0xff] }
  0xc2   : > { %v4657_v6 = vcombine.low %v589_v56, %v593_v57 }
  0xc4   : > { %3503 = vmatpush1.bf16.msra.mxu0 %v4593_v62  ;;  %3667 = vmatpush1.bf16.msra.mxu1 %v4595_v0  ;;  %v4651_v62 = vcombine.low %v582_v49, %v586_v50  ;;  %v4658_v0 = vcombine.high %v589_v56, %v593_v57  ;;  %v642_v49 = vld [vmem:[%s5285_s18 + $0xa68] sm:$0xff]  ;;  %v649_v56 = vld [vmem:[%s5285_s18 + $0xaa0] sm:$0xff] }
  0xc5   : > { %3504 = vmatprep.subr.bf16.mxu0 %v4602_v1  ;;  %3668 = vmatprep.subr.bf16.mxu1 %v4604_v2  ;;  %v4660_v1 = vcombine.high %v590_v58, %v594_v60  ;;  %v597_v2 = vld [vmem:[%s5285_s18 + $0x900] sm:$0xff]  ;;  %v646_v57 = vld [vmem:[%s5285_s18 + $0xa88] sm:$0xff] }
  0xc6   : > { %v4665_v15 = vcombine.low %v597_v2, %v601_v3 }
  0xc8   : > { %3505 = vmatpush1.bf16.msra.mxu0 %v4601_v7  ;;  %3669 = vmatpush1.bf16.msra.mxu1 %v4603_v8  ;;  %v4659_v7 = vcombine.low %v590_v58, %v594_v60  ;;  %v4666_v8 = vcombine.high %v597_v2, %v601_v3  ;;  %v650_v58 = vld [vmem:[%s5285_s18 + $0xaa8] sm:$0xff]  ;;  %v657_v2 = vld [vmem:[%s5285_s18 + $0xae0] sm:$0xff] }
  0xc9   : > { %3506 = vmatprep.subr.bf16.mxu0 %v4610_v10  ;;  %3670 = vmatprep.subr.bf16.mxu1 %v4612_v11  ;;  %v4668_v10 = vcombine.high %v598_v4, %v602_v5  ;;  %v605_v11 = vld [vmem:[%s5285_s18 + $0x940] sm:$0xff]  ;;  %v654_v3 = vld [vmem:[%s5285_s18 + $0xac8] sm:$0xff] }
  0xca   : > { %v4673_v23 = vcombine.low %v605_v11, %v609_v12 }
  0xcc   : > { %3507 = vmatpush1.bf16.msra.mxu0 %v4609_v16  ;;  %3671 = vmatpush1.bf16.msra.mxu1 %v4611_v17  ;;  %v4667_v16 = vcombine.low %v598_v4, %v602_v5  ;;  %v4674_v17 = vcombine.high %v605_v11, %v609_v12  ;;  %v658_v4 = vld [vmem:[%s5285_s18 + $0xae8] sm:$0xff]  ;;  %v665_v11 = vld [vmem:[%s5285_s18 + $0xb20] sm:$0xff] }
  0xcd   : > { %3508 = vmatprep.subr.bf16.mxu0 %v4618_v18  ;;  %3672 = vmatprep.subr.bf16.mxu1 %v4620_v19  ;;  %v4676_v18 = vcombine.high %v606_v13, %v610_v14  ;;  %v613_v19 = vld [vmem:[%s5285_s18 + $0x980] sm:$0xff]  ;;  %v662_v12 = vld [vmem:[%s5285_s18 + $0xb08] sm:$0xff] }
  0xce   : > { %v4681_v31 = vcombine.low %v613_v19, %v617_v20 }
  0xd0   : > { %3509 = vmatpush1.bf16.msra.mxu0 %v4617_v24  ;;  %3673 = vmatpush1.bf16.msra.mxu1 %v4619_v26  ;;  %v4675_v24 = vcombine.low %v606_v13, %v610_v14  ;;  %v4682_v26 = vcombine.high %v613_v19, %v617_v20  ;;  %v666_v13 = vld [vmem:[%s5285_s18 + $0xb28] sm:$0xff]  ;;  %v673_v19 = vld [vmem:[%s5285_s18 + $0xb60] sm:$0xff] }
  0xd1   : > { %3510 = vmatprep.subr.bf16.mxu0 %v4626_v27  ;;  %3674 = vmatprep.subr.bf16.mxu1 %v4628_v59  ;;  %v4684_v27 = vcombine.high %v614_v21, %v618_v22  ;;  %v621_v59 = vld [vmem:[%s5285_s18 + $0x9c0] sm:$0xff]  ;;  %v670_v20 = vld [vmem:[%s5285_s18 + $0xb48] sm:$0xff] }
  0xd2   : > { %v4689_v53 = vcombine.low %v621_v59, %v625_v28 }
  0xd4   : > { %3511 = vmatpush1.bf16.msra.mxu0 %v4625_v32  ;;  %3675 = vmatpush1.bf16.msra.mxu1 %v4627_v33  ;;  %v4683_v32 = vcombine.low %v614_v21, %v618_v22  ;;  %v4690_v33 = vcombine.high %v621_v59, %v625_v28  ;;  %v674_v21 = vld [vmem:[%s5285_s18 + $0xb68] sm:$0xff]  ;;  %v681_v59 = vld [vmem:[%s5285_s18 + $0xba0] sm:$0xff] }
  0xd5   : > { %3521 = vmatprep.subr.bf16.mxu0 %v4634_v36  ;;  %3685 = vmatprep.subr.bf16.mxu1 %v4636_v37  ;;  %v4692_v36 = vcombine.high %v622_v29, %v626_v30  ;;  %v629_v37 = vld [vmem:[%s5285_s18 + $0xa00] sm:$0xff]  ;;  %v678_v28 = vld [vmem:[%s5285_s18 + $0xb88] sm:$0xff] }
  0xd6   : > { %v4697_v50 = vcombine.low %v629_v37, %v633_v38 }
  0xd7   : > { %3513 = vmatmul.mubr.bf16.vlgmr.msra.gmra.mrb[0].mxu0 %v5475_v40  ;;  %3677 = vmatmul.mubr.bf16.vlgmr.msra.gmra.mrb[0].mxu1 %v5475_v40 }
  0xd8   : > { %3522 = vmatpush1.bf16.msra.mxu0 %v4633_v42  ;;  %3686 = vmatpush1.bf16.msra.mxu1 %v4635_v43  ;;  %v4691_v42 = vcombine.low %v622_v29, %v626_v30  ;;  %v4698_v43 = vcombine.high %v629_v37, %v633_v38  ;;  %v682_v29 = vld [vmem:[%s5285_s18 + $0xba8] sm:$0xff]  ;;  %v689_v37 = vld [vmem:[%s5285_s18 + $0xbe0] sm:$0xff] }
  0xd9   : > { %3523 = vmatprep.subr.bf16.mxu0 %v4642_v45  ;;  %3687 = vmatprep.subr.bf16.mxu1 %v4644_v46  ;;  %v4700_v45 = vcombine.high %v630_v39, %v634_v41  ;;  %v637_v46 = vld [vmem:[%s5285_s18 + $0xa40] sm:$0xff]  ;;  %v686_v38 = vld [vmem:[%s5285_s18 + $0xbc8] sm:$0xff] }
  0xda   : > { %3553 = vmatprep.mubr.bf16.mxu0 %v5404_v34  ;;  %3717 = vmatprep.mubr.bf16.mxu1 %v5404_v34  ;;  %v4705_v60 = vcombine.low %v637_v46, %v641_v47 }
  0xdc   : > { %3524 = vmatpush1.bf16.msra.mxu0 %v4641_v51  ;;  %3688 = vmatpush1.bf16.msra.mxu1 %v4643_v52  ;;  %v4699_v51 = vcombine.low %v630_v39, %v634_v41  ;;  %v4706_v52 = vcombine.high %v637_v46, %v641_v47  ;;  %v690_v39 = vld [vmem:[%s5285_s18 + $0xbe8] sm:$0xff]  ;;  %v697_v46 = vld [vmem:[%s5285_s18 + $0xc20] sm:$0xff] }
  0xdd   : > { %3525 = vmatprep.subr.bf16.mxu0 %v4650_v54  ;;  %3689 = vmatprep.subr.bf16.mxu1 %v4652_v55  ;;  %v4708_v54 = vcombine.high %v638_v48, %v642_v49  ;;  %v645_v55 = vld [vmem:[%s5285_s18 + $0xa80] sm:$0xff]  ;;  %v694_v47 = vld [vmem:[%s5285_s18 + $0xc08] sm:$0xff] }
  0xde   : > { %v4713_v5 = vcombine.low %v645_v55, %v649_v56 }
  0xe0   : > { %3526 = vmatpush1.bf16.msra.mxu0 %v4649_v61  ;;  %3690 = vmatpush1.bf16.msra.mxu1 %v4651_v62  ;;  %v4707_v61 = vcombine.low %v638_v48, %v642_v49  ;;  %v4714_v62 = vcombine.high %v645_v55, %v649_v56  ;;  %v698_v48 = vld [vmem:[%s5285_s18 + $0xc28] sm:$0xff]  ;;  %v705_v55 = vld [vmem:[%s5285_s18 + $0xc60] sm:$0xff] }
  0xe1   : > { %3527 = vmatprep.subr.bf16.mxu0 %v4658_v0  ;;  %3691 = vmatprep.subr.bf16.mxu1 %v4660_v1  ;;  %v4716_v0 = vcombine.high %v646_v57, %v650_v58  ;;  %v653_v1 = vld [vmem:[%s5285_s18 + $0xac0] sm:$0xff]  ;;  %v702_v56 = vld [vmem:[%s5285_s18 + $0xc48] sm:$0xff] }
  0xe2   : > { %v4721_v14 = vcombine.low %v653_v1, %v657_v2 }
  0xe4   : > { %3528 = vmatpush1.bf16.msra.mxu0 %v4657_v6  ;;  %3692 = vmatpush1.bf16.msra.mxu1 %v4659_v7  ;;  %v4715_v6 = vcombine.low %v646_v57, %v650_v58  ;;  %v4722_v7 = vcombine.high %v653_v1, %v657_v2  ;;  %v706_v57 = vld [vmem:[%s5285_s18 + $0xc68] sm:$0xff]  ;;  %v713_v1 = vld [vmem:[%s5285_s18 + $0xca0] sm:$0xff]  ;;  %v5551_v2 = vcombine.high %v5404_v34, %v5404_v34 }
  0xe5   : > { %3529 = vmatprep.subr.bf16.mxu0 %v4666_v8  ;;  %3693 = vmatprep.subr.bf16.mxu1 %v4668_v10  ;;  %v4724_v8 = vcombine.high %v654_v3, %v658_v4  ;;  %v661_v10 = vld [vmem:[%s5285_s18 + $0xb00] sm:$0xff] }
  0xe6   : > { %v4729_v22 = vcombine.low %v661_v10, %v665_v11 }
  0xe8   : > { %3530 = vmatpush1.bf16.msra.mxu0 %v4665_v15  ;;  %3694 = vmatpush1.bf16.msra.mxu1 %v4667_v16  ;;  %v4723_v15 = vcombine.low %v654_v3, %v658_v4  ;;  %v4730_v16 = vcombine.high %v661_v10, %v665_v11  ;;  %v710_v3 = vld [vmem:[%s5285_s18 + $0xc88] sm:$0xff]  ;;  %v717_v10 = vld [vmem:[%s5285_s18 + $0xcc0] sm:$0xff] }
  0xe9   : > { %3531 = vmatprep.subr.bf16.mxu0 %v4674_v17  ;;  %3695 = vmatprep.subr.bf16.mxu1 %v4676_v18  ;;  %v4732_v17 = vcombine.high %v662_v12, %v666_v13  ;;  %v669_v18 = vld [vmem:[%s5285_s18 + $0xb40] sm:$0xff]  ;;  %v714_v4 = vld [vmem:[%s5285_s18 + $0xca8] sm:$0xff] }
  0xea   : > { %v4737_v30 = vcombine.low %v669_v18, %v673_v19  ;;  %v721_v11 = vld [vmem:[%s5285_s18 + $0xce0] sm:$0xff] }
  0xec   : > { %3532 = vmatpush1.bf16.msra.mxu0 %v4673_v23  ;;  %3696 = vmatpush1.bf16.msra.mxu1 %v4675_v24  ;;  %v4731_v23 = vcombine.low %v662_v12, %v666_v13  ;;  %v4738_v24 = vcombine.high %v669_v18, %v673_v19  ;;  %v718_v12 = vld [vmem:[%s5285_s18 + $0xcc8] sm:$0xff]  ;;  %v725_v18 = vld [vmem:[%s5285_s18 + $0xd00] sm:$0xff] }
  0xed   : > { %3533 = vmatprep.subr.bf16.mxu0 %v4682_v26  ;;  %3697 = vmatprep.subr.bf16.mxu1 %v4684_v27  ;;  %v4740_v26 = vcombine.high %v670_v20, %v674_v21  ;;  %v677_v27 = vld [vmem:[%s5285_s18 + $0xb80] sm:$0xff]  ;;  %v722_v13 = vld [vmem:[%s5285_s18 + $0xce8] sm:$0xff] }
  0xee   : > { %v4745_v41 = vcombine.low %v677_v27, %v681_v59  ;;  %v729_v19 = vld [vmem:[%s5285_s18 + $0xd20] sm:$0xff] }
  0xf0   : > { %3534 = vmatpush1.bf16.msra.mxu0 %v4681_v31  ;;  %3698 = vmatpush1.bf16.msra.mxu1 %v4683_v32  ;;  %v4739_v31 = vcombine.low %v670_v20, %v674_v21  ;;  %v4746_v32 = vcombine.high %v677_v27, %v681_v59  ;;  %v726_v20 = vld [vmem:[%s5285_s18 + $0xd08] sm:$0xff]  ;;  %v733_v27 = vld [vmem:[%s5285_s18 + $0xd40] sm:$0xff] }
  0xf1   : > { %3535 = vmatprep.subr.bf16.mxu0 %v4690_v33  ;;  %3699 = vmatprep.subr.bf16.mxu1 %v4692_v36  ;;  %v4748_v33 = vcombine.high %v678_v28, %v682_v29  ;;  %v685_v36 = vld [vmem:[%s5285_s18 + $0xbc0] sm:$0xff]  ;;  %v730_v21 = vld [vmem:[%s5285_s18 + $0xd28] sm:$0xff] }
  0xf2   : > { %v4753_v49 = vcombine.low %v685_v36, %v689_v37  ;;  %v737_v59 = vld [vmem:[%s5285_s18 + $0xd60] sm:$0xff] }
  0xf4   : > { %3536 = vmatpush1.bf16.msra.mxu0 %v4689_v53  ;;  %3700 = vmatpush1.bf16.msra.mxu1 %v4691_v42  ;;  %v4747_v53 = vcombine.low %v678_v28, %v682_v29  ;;  %v4754_v42 = vcombine.high %v685_v36, %v689_v37  ;;  %v734_v28 = vld [vmem:[%s5285_s18 + $0xd48] sm:$0xff]  ;;  %v741_v36 = vld [vmem:[%s5285_s18 + $0xd80] sm:$0xff] }
  0xf5   : > { %3537 = vmatprep.subr.bf16.mxu0 %v4698_v43  ;;  %3701 = vmatprep.subr.bf16.mxu1 %v4700_v45  ;;  %v4756_v43 = vcombine.high %v686_v38, %v690_v39  ;;  %v693_v45 = vld [vmem:[%s5285_s18 + $0xc00] sm:$0xff]  ;;  %v738_v29 = vld [vmem:[%s5285_s18 + $0xd68] sm:$0xff] }
  0xf6   : > { %v4761_v58 = vcombine.low %v693_v45, %v697_v46  ;;  %v745_v37 = vld [vmem:[%s5285_s18 + $0xda0] sm:$0xff] }
  0xf8   : > { %3538 = vmatpush1.bf16.msra.mxu0 %v4697_v50  ;;  %3702 = vmatpush1.bf16.msra.mxu1 %v4699_v51  ;;  %v4755_v50 = vcombine.low %v686_v38, %v690_v39  ;;  %v4762_v51 = vcombine.high %v693_v45, %v697_v46  ;;  %v742_v38 = vld [vmem:[%s5285_s18 + $0xd88] sm:$0xff]  ;;  %v749_v45 = vld [vmem:[%s5285_s18 + $0xdc0] sm:$0xff] }
  0xf9   : > { %3539 = vmatprep.subr.bf16.mxu0 %v4706_v52  ;;  %3703 = vmatprep.subr.bf16.mxu1 %v4708_v54  ;;  %v4764_v52 = vcombine.high %v694_v47, %v698_v48  ;;  %v701_v54 = vld [vmem:[%s5285_s18 + $0xc40] sm:$0xff]  ;;  %v746_v39 = vld [vmem:[%s5285_s18 + $0xda8] sm:$0xff] }
  0xfa   : > { %v753_v46 = vld [vmem:[%s5285_s18 + $0xde0] sm:$0xff] }
  0xfc   : > { %3540 = vmatpush1.bf16.msra.mxu0 %v4705_v60  ;;  %3704 = vmatpush1.bf16.msra.mxu1 %v4707_v61  ;;  %v4763_v60 = vcombine.low %v694_v47, %v698_v48  ;;  %v4770_v61 = vcombine.high %v701_v54, %v705_v55  ;;  %v750_v47 = vld [vmem:[%s5285_s18 + $0xdc8] sm:$0xff] }
  0xfd   : > { %3541 = vmatprep.subr.bf16.mxu0 %v4714_v62  ;;  %3705 = vmatprep.subr.bf16.mxu1 %v4716_v0  ;;  %v4772_v62 = vcombine.high %v702_v56, %v706_v57  ;;  %v709_v0 = vld [vmem:[%s5285_s18 + $0xc80] sm:$0xff]  ;;  %v754_v48 = vld [vmem:[%s5285_s18 + $0xde8] sm:$0xff] }
 0x100   : > { %3542 = vmatpush1.bf16.msra.mxu0 %v4713_v5  ;;  %3706 = vmatpush1.bf16.msra.mxu1 %v4715_v6  ;;  %v4769_v5 = vcombine.low %v701_v54, %v705_v55  ;;  %v4771_v6 = vcombine.low %v702_v56, %v706_v57  ;;  %v757_v54 = vld [vmem:[%s5285_s18 + $0xe00] sm:$0xff]  ;;  %v758_v56 = vld [vmem:[%s5285_s18 + $0xe08] sm:$0xff] }
 0x101   : > { %3543 = vmatprep.subr.bf16.mxu0 %v4722_v7  ;;  %3707 = vmatprep.subr.bf16.mxu1 %v4724_v8  ;;  %v4778_v7 = vcombine.high %v709_v0, %v713_v1  ;;  %v4780_v8 = vcombine.high %v710_v3, %v714_v4  ;;  %v761_v55 = vld [vmem:[%s5285_s18 + $0xe20] sm:$0xff]  ;;  %v762_v57 = vld [vmem:[%s5285_s18 + $0xe28] sm:$0xff] }
 0x104   : > { %3544 = vmatpush1.bf16.msra.mxu0 %v4721_v14  ;;  %3708 = vmatpush1.bf16.msra.mxu1 %v4723_v15  ;;  %v4777_v14 = vcombine.low %v709_v0, %v713_v1  ;;  %v4779_v15 = vcombine.low %v710_v3, %v714_v4  ;;  %v765_v0 = vld [vmem:[%s5285_s18 + $0xe40] sm:$0xff]  ;;  %v766_v3 = vld [vmem:[%s5285_s18 + $0xe48] sm:$0xff] }
 0x105   : > { %3545 = vmatprep.subr.bf16.mxu0 %v4730_v16  ;;  %3709 = vmatprep.subr.bf16.mxu1 %v4732_v17  ;;  %v4786_v16 = vcombine.high %v717_v10, %v721_v11  ;;  %v4788_v17 = vcombine.high %v718_v12, %v722_v13  ;;  %v769_v1 = vld [vmem:[%s5285_s18 + $0xe60] sm:$0xff]  ;;  %v770_v4 = vld [vmem:[%s5285_s18 + $0xe68] sm:$0xff] }
 0x108   : > { %3546 = vmatpush1.bf16.msra.mxu0 %v4729_v22  ;;  %3710 = vmatpush1.bf16.msra.mxu1 %v4731_v23  ;;  %v4785_v22 = vcombine.low %v717_v10, %v721_v11  ;;  %v4787_v23 = vcombine.low %v718_v12, %v722_v13  ;;  %v773_v10 = vld [vmem:[%s5285_s18 + $0xe80] sm:$0xff]  ;;  %v774_v12 = vld [vmem:[%s5285_s18 + $0xe88] sm:$0xff] }
 0x109   : > { %3547 = vmatprep.subr.bf16.mxu0 %v4738_v24  ;;  %3711 = vmatprep.subr.bf16.mxu1 %v4740_v26  ;;  %v4794_v24 = vcombine.high %v725_v18, %v729_v19  ;;  %v4796_v26 = vcombine.high %v726_v20, %v730_v21  ;;  %v777_v11 = vld [vmem:[%s5285_s18 + $0xea0] sm:$0xff]  ;;  %v778_v13 = vld [vmem:[%s5285_s18 + $0xea8] sm:$0xff] }
 0x10c   : > { %3548 = vmatpush1.bf16.msra.mxu0 %v4737_v30  ;;  %3712 = vmatpush1.bf16.msra.mxu1 %v4739_v31  ;;  %v4793_v30 = vcombine.low %v725_v18, %v729_v19  ;;  %v4795_v31 = vcombine.low %v726_v20, %v730_v21  ;;  %v781_v18 = vld [vmem:[%s5285_s18 + $0xec0] sm:$0xff]  ;;  %v782_v20 = vld [vmem:[%s5285_s18 + $0xec8] sm:$0xff] }
 0x10d   : > { %3549 = vmatprep.subr.bf16.mxu0 %v4746_v32  ;;  %3713 = vmatprep.subr.bf16.mxu1 %v4748_v33  ;;  %v4802_v32 = vcombine.high %v733_v27, %v737_v59  ;;  %v4804_v33 = vcombine.high %v734_v28, %v738_v29  ;;  %v785_v19 = vld [vmem:[%s5285_s18 + $0xee0] sm:$0xff]  ;;  %v786_v21 = vld [vmem:[%s5285_s18 + $0xee8] sm:$0xff] }
 0x110   : > { %3550 = vmatpush1.bf16.msra.mxu0 %v4745_v41  ;;  %3714 = vmatpush1.bf16.msra.mxu1 %v4747_v53  ;;  %v4801_v41 = vcombine.low %v733_v27, %v737_v59  ;;  %v4803_v53 = vcombine.low %v734_v28, %v738_v29  ;;  %v789_v27 = vld [vmem:[%s5285_s18 + $0xf00] sm:$0xff]  ;;  %v790_v28 = vld [vmem:[%s5285_s18 + $0xf08] sm:$0xff] }
 0x111   : > { %3551 = vmatprep.subr.bf16.mxu0 %v4754_v42  ;;  %3715 = vmatprep.subr.bf16.mxu1 %v4756_v43  ;;  %v4810_v42 = vcombine.high %v741_v36, %v745_v37  ;;  %v4812_v43 = vcombine.high %v742_v38, %v746_v39  ;;  %v793_v59 = vld [vmem:[%s5285_s18 + $0xf20] sm:$0xff]  ;;  %v794_v29 = vld [vmem:[%s5285_s18 + $0xf28] sm:$0xff] }
 0x114   : > { %3552 = vmatpush1.bf16.msra.mxu0 %v4753_v49  ;;  %3716 = vmatpush1.bf16.msra.mxu1 %v4755_v50  ;;  %v4809_v49 = vcombine.low %v741_v36, %v745_v37  ;;  %v4811_v50 = vcombine.low %v742_v38, %v746_v39  ;;  %v797_v36 = vld [vmem:[%s5285_s18 + $0xf40] sm:$0xff]  ;;  %v798_v38 = vld [vmem:[%s5285_s18 + $0xf48] sm:$0xff] }
 0x115   : > { %3562 = vmatprep.subr.bf16.mxu0 %v4762_v51  ;;  %3726 = vmatprep.subr.bf16.mxu1 %v4764_v52  ;;  %v4818_v51 = vcombine.high %v749_v45, %v753_v46  ;;  %v4820_v52 = vcombine.high %v750_v47, %v754_v48  ;;  %v801_v37 = vld [vmem:[%s5285_s18 + $0xf60] sm:$0xff]  ;;  %v802_v39 = vld [vmem:[%s5285_s18 + $0xf68] sm:$0xff] }
 0x117   : > { %3554 = vmatmul.mubr.bf16.vlgmr.msra.gmra.mrb[0].mxu0 %v5407_v35  ;;  %3718 = vmatmul.mubr.bf16.vlgmr.msra.gmra.mrb[0].mxu1 %v5407_v35 }
 0x118   : > { %3563 = vmatpush1.bf16.msra.mxu0 %v4761_v58  ;;  %3727 = vmatpush1.bf16.msra.mxu1 %v4763_v60  ;;  %v4817_v58 = vcombine.low %v749_v45, %v753_v46  ;;  %v4819_v60 = vcombine.low %v750_v47, %v754_v48  ;;  %v805_v45 = vld [vmem:[%s5285_s18 + $0xf80] sm:$0xff]  ;;  %v806_v47 = vld [vmem:[%s5285_s18 + $0xf88] sm:$0xff] }
 0x119   : > { %3564 = vmatprep.subr.bf16.mxu0 %v4770_v61  ;;  %3728 = vmatprep.subr.bf16.mxu1 %v4772_v62  ;;  %v4826_v61 = vcombine.high %v757_v54, %v761_v55  ;;  %v4828_v62 = vcombine.high %v758_v56, %v762_v57  ;;  %v809_v46 = vld [vmem:[%s5285_s18 + $0xfa0] sm:$0xff]  ;;  %v810_v48 = vld [vmem:[%s5285_s18 + $0xfa8] sm:$0xff] }
 0x11a   : > { %3594 = vmatprep.mubr.bf16.mxu0 %v5551_v2  ;;  %3758 = vmatprep.mubr.bf16.mxu1 %v5551_v2 }
 0x11c   : > { %3565 = vmatpush1.bf16.msra.mxu0 %v4769_v5  ;;  %3729 = vmatpush1.bf16.msra.mxu1 %v4771_v6  ;;  %v4825_v5 = vcombine.low %v757_v54, %v761_v55  ;;  %v4827_v6 = vcombine.low %v758_v56, %v762_v57  ;;  %v813_v54 = vld [vmem:[%s5285_s18 + $0xfc0] sm:$0xff]  ;;  %v814_v56 = vld [vmem:[%s5285_s18 + $0xfc8] sm:$0xff] }
 0x11d   : > { %3566 = vmatprep.subr.bf16.mxu0 %v4778_v7  ;;  %3730 = vmatprep.subr.bf16.mxu1 %v4780_v8  ;;  %v4834_v7 = vcombine.high %v765_v0, %v769_v1  ;;  %v4836_v8 = vcombine.high %v766_v3, %v770_v4  ;;  %v817_v55 = vld [vmem:[%s5285_s18 + $0xfe0] sm:$0xff]  ;;  %v818_v57 = vld [vmem:[%s5285_s18 + $0xfe8] sm:$0xff] }
 0x120   : > { %3567 = vmatpush1.bf16.msra.mxu0 %v4777_v14  ;;  %3731 = vmatpush1.bf16.msra.mxu1 %v4779_v15  ;;  %v4833_v14 = vcombine.low %v765_v0, %v769_v1  ;;  %v4835_v15 = vcombine.low %v766_v3, %v770_v4  ;;  %v311_v0 = vld [vmem:[%s5285_s18 + $0x10] sm:$0xff]  ;;  %v312_v3 = vld [vmem:[%s5285_s18 + $0x18] sm:$0xff] }
 0x121   : > { %3568 = vmatprep.subr.bf16.mxu0 %v4786_v16  ;;  %3732 = vmatprep.subr.bf16.mxu1 %v4788_v17  ;;  %v4842_v16 = vcombine.high %v773_v10, %v777_v11  ;;  %v4844_v17 = vcombine.high %v774_v12, %v778_v13  ;;  %v315_v1 = vld [vmem:[%s5285_s18 + $0x30] sm:$0xff]  ;;  %v316_v4 = vld [vmem:[%s5285_s18 + $0x38] sm:$0xff] }
 0x124   : > { %3569 = vmatpush1.bf16.msra.mxu0 %v4785_v22  ;;  %3733 = vmatpush1.bf16.msra.mxu1 %v4787_v23  ;;  %v4841_v22 = vcombine.low %v773_v10, %v777_v11  ;;  %v4843_v23 = vcombine.low %v774_v12, %v778_v13  ;;  %v319_v10 = vld [vmem:[%s5285_s18 + $0x50] sm:$0xff]  ;;  %v5619_v12 = vcombine.high %v5407_v35, %v5407_v35  ;;  %v320_v13 = vld [vmem:[%s5285_s18 + $0x58] sm:$0xff] }
 0x125   : > { %3570 = vmatprep.subr.bf16.mxu0 %v4794_v24  ;;  %3734 = vmatprep.subr.bf16.mxu1 %v4796_v26  ;;  %v4850_v24 = vcombine.high %v781_v18, %v785_v19  ;;  %v4852_v26 = vcombine.high %v782_v20, %v786_v21  ;;  %v323_v11 = vld [vmem:[%s5285_s18 + $0x70] sm:$0xff] }
 0x128   : > { %3571 = vmatpush1.bf16.msra.mxu0 %v4793_v30  ;;  %3735 = vmatpush1.bf16.msra.mxu1 %v4795_v31  ;;  %v4849_v30 = vcombine.low %v781_v18, %v785_v19  ;;  %v4851_v31 = vcombine.low %v782_v20, %v786_v21  ;;  %v327_v19 = vld [vmem:[%s5285_s18 + $0x90] sm:$0xff]  ;;  %v328_v21 = vld [vmem:[%s5285_s18 + $0x98] sm:$0xff] }
 0x129   : > { %3572 = vmatprep.subr.bf16.mxu0 %v4802_v32  ;;  %3736 = vmatprep.subr.bf16.mxu1 %v4804_v33  ;;  %v4858_v32 = vcombine.high %v789_v27, %v793_v59  ;;  %v4860_v33 = vcombine.high %v790_v28, %v794_v29  ;;  %v331_v20 = vld [vmem:[%s5285_s18 + $0xb0] sm:$0xff] }
 0x12c   : > { %3573 = vmatpush1.bf16.msra.mxu0 %v4801_v41  ;;  %3737 = vmatpush1.bf16.msra.mxu1 %v4803_v53  ;;  %v4857_v41 = vcombine.low %v789_v27, %v793_v59  ;;  %v4859_v53 = vcombine.low %v790_v28, %v794_v29  ;;  %v335_v59 = vld [vmem:[%s5285_s18 + $0xd0] sm:$0xff]  ;;  %v336_v29 = vld [vmem:[%s5285_s18 + $0xd8] sm:$0xff] }
 0x12d   : > { %3574 = vmatprep.subr.bf16.mxu0 %v4810_v42  ;;  %3738 = vmatprep.subr.bf16.mxu1 %v4812_v43  ;;  %v4866_v42 = vcombine.high %v797_v36, %v801_v37  ;;  %v4868_v43 = vcombine.high %v798_v38, %v802_v39  ;;  %v339_v28 = vld [vmem:[%s5285_s18 + $0xf0] sm:$0xff] }
 0x130   : > { %3575 = vmatpush1.bf16.msra.mxu0 %v4809_v49  ;;  %3739 = vmatpush1.bf16.msra.mxu1 %v4811_v50  ;;  %v4865_v49 = vcombine.low %v797_v36, %v801_v37  ;;  %v4867_v50 = vcombine.low %v798_v38, %v802_v39  ;;  %v343_v37 = vld [vmem:[%s5285_s18 + $0x110] sm:$0xff]  ;;  %v344_v39 = vld [vmem:[%s5285_s18 + $0x118] sm:$0xff] }
 0x131   : > { %3576 = vmatprep.subr.bf16.mxu0 %v4818_v51  ;;  %3740 = vmatprep.subr.bf16.mxu1 %v4820_v52  ;;  %v4874_v51 = vcombine.high %v805_v45, %v809_v46  ;;  %v4876_v52 = vcombine.high %v806_v47, %v810_v48  ;;  %v347_v38 = vld [vmem:[%s5285_s18 + $0x130] sm:$0xff] }
 0x134   : > { %3577 = vmatpush1.bf16.msra.mxu0 %v4817_v58  ;;  %3741 = vmatpush1.bf16.msra.mxu1 %v4819_v60  ;;  %v4873_v58 = vcombine.low %v805_v45, %v809_v46  ;;  %v4875_v60 = vcombine.low %v806_v47, %v810_v48  ;;  %v351_v45 = vld [vmem:[%s5285_s18 + $0x150] sm:$0xff]  ;;  %v352_v47 = vld [vmem:[%s5285_s18 + $0x158] sm:$0xff] }
 0x135   : > { %3578 = vmatprep.subr.bf16.mxu0 %v4826_v61  ;;  %3742 = vmatprep.subr.bf16.mxu1 %v4828_v62  ;;  %v4882_v61 = vcombine.high %v813_v54, %v817_v55  ;;  %v4884_v62 = vcombine.high %v814_v56, %v818_v57  ;;  %v355_v46 = vld [vmem:[%s5285_s18 + $0x170] sm:$0xff]  ;;  %v356_v48 = vld [vmem:[%s5285_s18 + $0x178] sm:$0xff] }
 0x138   : > { %3579 = vmatpush1.bf16.msra.mxu0 %v4825_v5  ;;  %3743 = vmatpush1.bf16.msra.mxu1 %v4827_v6  ;;  %v4881_v5 = vcombine.low %v813_v54, %v817_v55  ;;  %v4883_v6 = vcombine.low %v814_v56, %v818_v57  ;;  %v359_v54 = vld [vmem:[%s5285_s18 + $0x190] sm:$0xff]  ;;  %v360_v56 = vld [vmem:[%s5285_s18 + $0x198] sm:$0xff] }
 0x139   : > { %3580 = vmatprep.subr.bf16.mxu0 %v4834_v7  ;;  %3744 = vmatprep.subr.bf16.mxu1 %v4836_v8  ;;  %v4382_v7 = vcombine.high %v311_v0, %v315_v1  ;;  %v4384_v8 = vcombine.high %v312_v3, %v316_v4  ;;  %v363_v55 = vld [vmem:[%s5285_s18 + $0x1b0] sm:$0xff]  ;;  %v364_v57 = vld [vmem:[%s5285_s18 + $0x1b8] sm:$0xff] }
 0x13c   : > { %3581 = vmatpush1.bf16.msra.mxu0 %v4833_v14  ;;  %3745 = vmatpush1.bf16.msra.mxu1 %v4835_v15  ;;  %v324_v14 = vld [vmem:[%s5285_s18 + $0x78] sm:$0xff]  ;;  %v4381_v15 = vcombine.low %v311_v0, %v315_v1  ;;  %v367_v0 = vld [vmem:[%s5285_s18 + $0x1d0] sm:$0xff] }
 0x13d   : > { %3582 = vmatprep.subr.bf16.mxu0 %v4842_v16  ;;  %3746 = vmatprep.subr.bf16.mxu1 %v4844_v17  ;;  %v4383_v16 = vcombine.low %v312_v3, %v316_v4  ;;  %v4390_v17 = vcombine.high %v319_v10, %v323_v11  ;;  %v4392_v18 = vcombine.high %v320_v13, %v324_v14  ;;  %v371_v1 = vld [vmem:[%s5285_s18 + $0x1f0] sm:$0xff]  ;;  %v368_v3 = vld [vmem:[%s5285_s18 + $0x1d8] sm:$0xff] }
 0x13e   : > { %v372_v4 = vld [vmem:[%s5285_s18 + $0x1f8] sm:$0xff] }
 0x140   : > { %3583 = vmatpush1.bf16.msra.mxu0 %v4841_v22  ;;  %3747 = vmatpush1.bf16.msra.mxu1 %v4843_v23  ;;  %v332_v22 = vld [vmem:[%s5285_s18 + $0xb8] sm:$0xff]  ;;  %v4389_v23 = vcombine.low %v319_v10, %v323_v11  ;;  %v375_v10 = vld [vmem:[%s5285_s18 + $0x210] sm:$0xff] }
 0x141   : > { %3584 = vmatprep.subr.bf16.mxu0 %v4850_v24  ;;  %3748 = vmatprep.subr.bf16.mxu1 %v4852_v26  ;;  %v4391_v24 = vcombine.low %v320_v13, %v324_v14  ;;  %v4398_v26 = vcombine.high %v327_v19, %v331_v20  ;;  %v4400_v27 = vcombine.high %v328_v21, %v332_v22  ;;  %v379_v11 = vld [vmem:[%s5285_s18 + $0x230] sm:$0xff]  ;;  %v376_v13 = vld [vmem:[%s5285_s18 + $0x218] sm:$0xff] }
 0x142   : > { %v380_v14 = vld [vmem:[%s5285_s18 + $0x238] sm:$0xff] }
 0x144   : > { %3585 = vmatpush1.bf16.msra.mxu0 %v4849_v30  ;;  %3749 = vmatpush1.bf16.msra.mxu1 %v4851_v31  ;;  %v340_v30 = vld [vmem:[%s5285_s18 + $0xf8] sm:$0xff]  ;;  %v4397_v31 = vcombine.low %v327_v19, %v331_v20  ;;  %v383_v19 = vld [vmem:[%s5285_s18 + $0x250] sm:$0xff] }
 0x145   : > { %3586 = vmatprep.subr.bf16.mxu0 %v4858_v32  ;;  %3750 = vmatprep.subr.bf16.mxu1 %v4860_v33  ;;  %v4399_v32 = vcombine.low %v328_v21, %v332_v22  ;;  %v4406_v33 = vcombine.high %v335_v59, %v339_v28  ;;  %v4408_v36 = vcombine.high %v336_v29, %v340_v30  ;;  %v387_v20 = vld [vmem:[%s5285_s18 + $0x270] sm:$0xff]  ;;  %v384_v21 = vld [vmem:[%s5285_s18 + $0x258] sm:$0xff] }
 0x146   : > { %v388_v22 = vld [vmem:[%s5285_s18 + $0x278] sm:$0xff] }
 0x148   : > { %3587 = vmatpush1.bf16.msra.mxu0 %v4857_v41  ;;  %3751 = vmatpush1.bf16.msra.mxu1 %v4859_v53  ;;  %v348_v41 = vld [vmem:[%s5285_s18 + $0x138] sm:$0xff]  ;;  %v4405_v53 = vcombine.low %v335_v59, %v339_v28  ;;  %v391_v59 = vld [vmem:[%s5285_s18 + $0x290] sm:$0xff] }
 0x149   : > { %3588 = vmatprep.subr.bf16.mxu0 %v4866_v42  ;;  %3752 = vmatprep.subr.bf16.mxu1 %v4868_v43  ;;  %v4414_v42 = vcombine.high %v343_v37, %v347_v38  ;;  %v4416_v43 = vcombine.high %v344_v39, %v348_v41  ;;  %v395_v28 = vld [vmem:[%s5285_s18 + $0x2b0] sm:$0xff] }
 0x14c   : > { %3589 = vmatpush1.bf16.msra.mxu0 %v4865_v49  ;;  %3753 = vmatpush1.bf16.msra.mxu1 %v4867_v50  ;;  %v4413_v49 = vcombine.low %v343_v37, %v347_v38  ;;  %v4415_v50 = vcombine.low %v344_v39, %v348_v41  ;;  %v399_v37 = vld [vmem:[%s5285_s18 + $0x2d0] sm:$0xff]  ;;  %v400_v39 = vld [vmem:[%s5285_s18 + $0x2d8] sm:$0xff] }
 0x14d   : > { %3590 = vmatprep.subr.bf16.mxu0 %v4874_v51  ;;  %3754 = vmatprep.subr.bf16.mxu1 %v4876_v52  ;;  %v4422_v51 = vcombine.high %v351_v45, %v355_v46  ;;  %v4424_v52 = vcombine.high %v352_v47, %v356_v48  ;;  %v403_v38 = vld [vmem:[%s5285_s18 + $0x2f0] sm:$0xff]  ;;  %v404_v41 = vld [vmem:[%s5285_s18 + $0x2f8] sm:$0xff] }
 0x150   : > { %3591 = vmatpush1.bf16.msra.mxu0 %v4873_v58  ;;  %3755 = vmatpush1.bf16.msra.mxu1 %v4875_v60  ;;  %v4421_v58 = vcombine.low %v351_v45, %v355_v46  ;;  %v4423_v60 = vcombine.low %v352_v47, %v356_v48  ;;  %v407_v45 = vld [vmem:[%s5285_s18 + $0x310] sm:$0xff]  ;;  %v408_v47 = vld [vmem:[%s5285_s18 + $0x318] sm:$0xff] }
 0x151   : > { %3592 = vmatprep.subr.bf16.mxu0 %v4882_v61  ;;  %3756 = vmatprep.subr.bf16.mxu1 %v4884_v62  ;;  %v4430_v61 = vcombine.high %v359_v54, %v363_v55  ;;  %v4432_v62 = vcombine.high %v360_v56, %v364_v57  ;;  %v411_v46 = vld [vmem:[%s5285_s18 + $0x330] sm:$0xff]  ;;  %v412_v48 = vld [vmem:[%s5285_s18 + $0x338] sm:$0xff] }
 0x154   : > { %3593 = vmatpush1.bf16.msra.mxu0 %v4881_v5  ;;  %3757 = vmatpush1.bf16.msra.mxu1 %v4883_v6  ;;  %v4429_v5 = vcombine.low %v359_v54, %v363_v55  ;;  %v4431_v6 = vcombine.low %v360_v56, %v364_v57  ;;  %v415_v54 = vld [vmem:[%s5285_s18 + $0x350] sm:$0xff]  ;;  %v416_v56 = vld [vmem:[%s5285_s18 + $0x358] sm:$0xff] }
 0x155   : > { %3767 = vmatprep.subr.bf16.mxu0 %v4382_v7  ;;  %3931 = vmatprep.subr.bf16.mxu1 %v4384_v8  ;;  %v4438_v7 = vcombine.high %v367_v0, %v371_v1  ;;  %v4440_v8 = vcombine.high %v368_v3, %v372_v4  ;;  %v419_v55 = vld [vmem:[%s5285_s18 + $0x370] sm:$0xff]  ;;  %v420_v57 = vld [vmem:[%s5285_s18 + $0x378] sm:$0xff] }
 0x157   : > { %3595 = vmatmul.mubr.bf16.vlgmr.msra.gmra.mrb[0].mxu0 %v5619_v12  ;;  %3759 = vmatmul.mubr.bf16.vlgmr.msra.gmra.mrb[0].mxu1 %v5619_v12 }
 0x158   : > { %3768 = vmatpush1.bf16.msra.mxu0 %v4381_v15  ;;  %3932 = vmatpush1.bf16.msra.mxu1 %v4383_v16  ;;  %v4437_v15 = vcombine.low %v367_v0, %v371_v1  ;;  %v4439_v16 = vcombine.low %v368_v3, %v372_v4  ;;  %v423_v0 = vld [vmem:[%s5285_s18 + $0x390] sm:$0xff]  ;;  %v424_v3 = vld [vmem:[%s5285_s18 + $0x398] sm:$0xff] }
 0x159   : > { %3769 = vmatprep.subr.bf16.mxu0 %v4390_v17  ;;  %3933 = vmatprep.subr.bf16.mxu1 %v4392_v18  ;;  %v4446_v17 = vcombine.high %v375_v10, %v379_v11  ;;  %v4448_v18 = vcombine.high %v376_v13, %v380_v14  ;;  %v427_v1 = vld [vmem:[%s5285_s18 + $0x3b0] sm:$0xff]  ;;  %v428_v4 = vld [vmem:[%s5285_s18 + $0x3b8] sm:$0xff] }
 0x15a   : > { %3799 = vmatprep.mubr.bf16.mxu0 %v5348_v9  ;;  %3963 = vmatprep.mubr.bf16.mxu1 %v5348_v9  ;;  %v4407_v9 = vcombine.low %v336_v29, %v340_v30  ;;  %v392_v29 = vld [vmem:[%s5285_s18 + $0x298] sm:$0xff] }
 0x15b   : > { %v396_v30 = vld [vmem:[%s5285_s18 + $0x2b8] sm:$0xff] }
 0x15c   : > { %3770 = vmatpush1.bf16.msra.mxu0 %v4389_v23  ;;  %3934 = vmatpush1.bf16.msra.mxu1 %v4391_v24  ;;  %v4445_v23 = vcombine.low %v375_v10, %v379_v11  ;;  %v4447_v24 = vcombine.low %v376_v13, %v380_v14  ;;  %v431_v10 = vld [vmem:[%s5285_s18 + $0x3d0] sm:$0xff]  ;;  %v432_v13 = vld [vmem:[%s5285_s18 + $0x3d8] sm:$0xff] }
 0x15d   : > { %3771 = vmatprep.subr.bf16.mxu0 %v4398_v26  ;;  %3935 = vmatprep.subr.bf16.mxu1 %v4400_v27  ;;  %v4454_v26 = vcombine.high %v383_v19, %v387_v20  ;;  %v4456_v27 = vcombine.high %v384_v21, %v388_v22  ;;  %v435_v11 = vld [vmem:[%s5285_s18 + $0x3f0] sm:$0xff]  ;;  %v436_v14 = vld [vmem:[%s5285_s18 + $0x3f8] sm:$0xff] }
 0x160   : > { %3772 = vmatpush1.bf16.msra.mxu0 %v4397_v31  ;;  %3936 = vmatpush1.bf16.msra.mxu1 %v4399_v32  ;;  %v4453_v31 = vcombine.low %v383_v19, %v387_v20  ;;  %v4455_v32 = vcombine.low %v384_v21, %v388_v22  ;;  %v439_v19 = vld [vmem:[%s5285_s18 + $0x410] sm:$0xff]  ;;  %v440_v21 = vld [vmem:[%s5285_s18 + $0x418] sm:$0xff] }
 0x161   : > { %3773 = vmatprep.subr.bf16.mxu0 %v4406_v33  ;;  %3937 = vmatprep.subr.bf16.mxu1 %v4408_v36  ;;  %v4462_v33 = vcombine.high %v391_v59, %v395_v28  ;;  %v4464_v36 = vcombine.high %v392_v29, %v396_v30  ;;  %v443_v20 = vld [vmem:[%s5285_s18 + $0x430] sm:$0xff]  ;;  %v444_v22 = vld [vmem:[%s5285_s18 + $0x438] sm:$0xff] }
 0x164   : > { %3774 = vmatpush1.bf16.msra.mxu0 %v4405_v53  ;;  %3938 = vmatpush1.bf16.msra.mxu1 %v4407_v9  ;;  %v4461_v53 = vcombine.low %v391_v59, %v395_v28  ;;  %v4463_v9 = vcombine.low %v392_v29, %v396_v30  ;;  %v447_v59 = vld [vmem:[%s5285_s18 + $0x450] sm:$0xff]  ;;  %v448_v29 = vld [vmem:[%s5285_s18 + $0x458] sm:$0xff] }
 0x165   : > { %3775 = vmatprep.subr.bf16.mxu0 %v4414_v42  ;;  %3939 = vmatprep.subr.bf16.mxu1 %v4416_v43  ;;  %v4470_v42 = vcombine.high %v399_v37, %v403_v38  ;;  %v4472_v43 = vcombine.high %v400_v39, %v404_v41  ;;  %v451_v28 = vld [vmem:[%s5285_s18 + $0x470] sm:$0xff]  ;;  %v452_v30 = vld [vmem:[%s5285_s18 + $0x478] sm:$0xff] }
 0x168   : > { %3776 = vmatpush1.bf16.msra.mxu0 %v4413_v49  ;;  %3940 = vmatpush1.bf16.msra.mxu1 %v4415_v50  ;;  %v4469_v49 = vcombine.low %v399_v37, %v403_v38  ;;  %v4471_v50 = vcombine.low %v400_v39, %v404_v41  ;;  %v455_v37 = vld [vmem:[%s5285_s18 + $0x490] sm:$0xff]  ;;  %v456_v39 = vld [vmem:[%s5285_s18 + $0x498] sm:$0xff] }
 0x169   : > { %3777 = vmatprep.subr.bf16.mxu0 %v4422_v51  ;;  %3941 = vmatprep.subr.bf16.mxu1 %v4424_v52  ;;  %v4478_v51 = vcombine.high %v407_v45, %v411_v46  ;;  %v4480_v52 = vcombine.high %v408_v47, %v412_v48  ;;  %v459_v38 = vld [vmem:[%s5285_s18 + $0x4b0] sm:$0xff]  ;;  %v460_v41 = vld [vmem:[%s5285_s18 + $0x4b8] sm:$0xff] }
 0x16c   : > { %3778 = vmatpush1.bf16.msra.mxu0 %v4421_v58  ;;  %3942 = vmatpush1.bf16.msra.mxu1 %v4423_v60  ;;  %v4477_v58 = vcombine.low %v407_v45, %v411_v46  ;;  %v4479_v60 = vcombine.low %v408_v47, %v412_v48  ;;  %v463_v45 = vld [vmem:[%s5285_s18 + $0x4d0] sm:$0xff]  ;;  %v464_v47 = vld [vmem:[%s5285_s18 + $0x4d8] sm:$0xff] }
 0x16d   : > { %3779 = vmatprep.subr.bf16.mxu0 %v4430_v61  ;;  %3943 = vmatprep.subr.bf16.mxu1 %v4432_v62  ;;  %v4486_v61 = vcombine.high %v415_v54, %v419_v55  ;;  %v4488_v62 = vcombine.high %v416_v56, %v420_v57  ;;  %v467_v46 = vld [vmem:[%s5285_s18 + $0x4f0] sm:$0xff]  ;;  %v468_v48 = vld [vmem:[%s5285_s18 + $0x4f8] sm:$0xff] }
 0x170   : > { %3780 = vmatpush1.bf16.msra.mxu0 %v4429_v5  ;;  %3944 = vmatpush1.bf16.msra.mxu1 %v4431_v6  ;;  %v4485_v5 = vcombine.low %v415_v54, %v419_v55  ;;  %v4487_v6 = vcombine.low %v416_v56, %v420_v57  ;;  %v475_v54 = vld [vmem:[%s5285_s18 + $0x530] sm:$0xff]  ;;  %v472_v55 = vld [vmem:[%s5285_s18 + $0x518] sm:$0xff]  ;;  %v4533_v57 = vcombine.low %v463_v45, %v467_v46 }
 0x171   : > { %3781 = vmatprep.subr.bf16.mxu0 %v4438_v7  ;;  %3945 = vmatprep.subr.bf16.mxu1 %v4440_v8  ;;  %v4494_v7 = vcombine.high %v423_v0, %v427_v1  ;;  %v4496_v8 = vcombine.high %v424_v3, %v428_v4  ;;  %v476_v56 = vld [vmem:[%s5285_s18 + $0x538] sm:$0xff] }
 0x174   : > { %3782 = vmatpush1.bf16.msra.mxu0 %v4437_v15  ;;  %3946 = vmatpush1.bf16.msra.mxu1 %v4439_v16  ;;  %v4493_v15 = vcombine.low %v423_v0, %v427_v1  ;;  %v4495_v16 = vcombine.low %v424_v3, %v428_v4  ;;  %v480_v0 = vld [vmem:[%s5285_s18 + $0x558] sm:$0xff]  ;;  %v4543_v4 = vcombine.low %v472_v55, %v476_v56 }
 0x175   : > { %3783 = vmatprep.subr.bf16.mxu0 %v4446_v17  ;;  %3947 = vmatprep.subr.bf16.mxu1 %v4448_v18  ;;  %v4502_v17 = vcombine.high %v431_v10, %v435_v11  ;;  %v4504_v18 = vcombine.high %v432_v13, %v436_v14  ;;  %v484_v1 = vld [vmem:[%s5285_s18 + $0x578] sm:$0xff] }
 0x178   : > { %3784 = vmatpush1.bf16.msra.mxu0 %v4445_v23  ;;  %3948 = vmatpush1.bf16.msra.mxu1 %v4447_v24  ;;  %v4501_v23 = vcombine.low %v431_v10, %v435_v11  ;;  %v4503_v24 = vcombine.low %v432_v13, %v436_v14  ;;  %v488_v10 = vld [vmem:[%s5285_s18 + $0x598] sm:$0xff]  ;;  %v4551_v14 = vcombine.low %v480_v0, %v484_v1 }
 0x179   : > { %3785 = vmatprep.subr.bf16.mxu0 %v4454_v26  ;;  %3949 = vmatprep.subr.bf16.mxu1 %v4456_v27  ;;  %v4510_v26 = vcombine.high %v439_v19, %v443_v20  ;;  %v4512_v27 = vcombine.high %v440_v21, %v444_v22  ;;  %v492_v11 = vld [vmem:[%s5285_s18 + $0x5b8] sm:$0xff] }
 0x17c   : > { %3786 = vmatpush1.bf16.msra.mxu0 %v4453_v31  ;;  %3950 = vmatpush1.bf16.msra.mxu1 %v4455_v32  ;;  %v4509_v31 = vcombine.low %v439_v19, %v443_v20  ;;  %v4511_v32 = vcombine.low %v440_v21, %v444_v22  ;;  %v496_v19 = vld [vmem:[%s5285_s18 + $0x5d8] sm:$0xff]  ;;  %v4559_v22 = vcombine.low %v488_v10, %v492_v11 }
 0x17d   : > { %3787 = vmatprep.subr.bf16.mxu0 %v4462_v33  ;;  %3951 = vmatprep.subr.bf16.mxu1 %v4464_v36  ;;  %v4518_v33 = vcombine.high %v447_v59, %v451_v28  ;;  %v4520_v36 = vcombine.high %v448_v29, %v452_v30  ;;  %v500_v20 = vld [vmem:[%s5285_s18 + $0x5f8] sm:$0xff] }
 0x180   : > { %3788 = vmatpush1.bf16.msra.mxu0 %v4461_v53  ;;  %3952 = vmatpush1.bf16.msra.mxu1 %v4463_v9  ;;  %v4517_v53 = vcombine.low %v447_v59, %v451_v28  ;;  %v4519_v9 = vcombine.low %v448_v29, %v452_v30  ;;  %v504_v59 = vld [vmem:[%s5285_s18 + $0x618] sm:$0xff]  ;;  %v4567_v30 = vcombine.low %v496_v19, %v500_v20 }
 0x181   : > { %3789 = vmatprep.subr.bf16.mxu0 %v4470_v42  ;;  %3953 = vmatprep.subr.bf16.mxu1 %v4472_v43  ;;  %v4526_v42 = vcombine.high %v455_v37, %v459_v38  ;;  %v4528_v43 = vcombine.high %v456_v39, %v460_v41  ;;  %v508_v28 = vld [vmem:[%s5285_s18 + $0x638] sm:$0xff] }
 0x184   : > { %3790 = vmatpush1.bf16.msra.mxu0 %v4469_v49  ;;  %3954 = vmatpush1.bf16.msra.mxu1 %v4471_v50  ;;  %v4527_v49 = vcombine.low %v456_v39, %v460_v41  ;;  %v4534_v50 = vcombine.high %v463_v45, %v467_v46  ;;  %v4575_v41 = vcombine.low %v504_v59, %v508_v28  ;;  %v520_v45 = vld [vmem:[%s5285_s18 + $0x698] sm:$0xff] }
 0x185   : > { %3791 = vmatprep.subr.bf16.mxu0 %v4478_v51  ;;  %3955 = vmatprep.subr.bf16.mxu1 %v4480_v52  ;;  %v4536_v51 = vcombine.high %v464_v47, %v468_v48  ;;  %v471_v52 = vld [vmem:[%s5285_s18 + $0x510] sm:$0xff]  ;;  %v524_v46 = vld [vmem:[%s5285_s18 + $0x6b8] sm:$0xff] }
 0x186   : > { %v4541_v3 = vcombine.low %v471_v52, %v475_v54 }
 0x188   : > { %3792 = vmatpush1.bf16.msra.mxu0 %v4477_v58  ;;  %3956 = vmatpush1.bf16.msra.mxu1 %v4479_v60  ;;  %v4542_v58 = vcombine.high %v471_v52, %v475_v54  ;;  %v4544_v60 = vcombine.high %v472_v55, %v476_v56  ;;  %v528_v52 = vld [vmem:[%s5285_s18 + $0x6d8] sm:$0xff]  ;;  %v4591_v56 = vcombine.low %v520_v45, %v524_v46 }
 0x189   : > { %3793 = vmatprep.subr.bf16.mxu0 %v4486_v61  ;;  %3957 = vmatprep.subr.bf16.mxu1 %v4488_v62  ;;  %v479_v61 = vld [vmem:[%s5285_s18 + $0x550] sm:$0xff]  ;;  %v532_v54 = vld [vmem:[%s5285_s18 + $0x6f8] sm:$0xff] }
 0x18a   : > { %v483_v62 = vld [vmem:[%s5285_s18 + $0x570] sm:$0xff] }
 0x18b   : > { %v4549_v13 = vcombine.low %v479_v61, %v483_v62 }
 0x18c   : > { %3794 = vmatpush1.bf16.msra.mxu0 %v4485_v5  ;;  %3958 = vmatpush1.bf16.msra.mxu1 %v4487_v6  ;;  %v4550_v5 = vcombine.high %v479_v61, %v483_v62  ;;  %v4552_v6 = vcombine.high %v480_v0, %v484_v1  ;;  %v536_v61 = vld [vmem:[%s5285_s18 + $0x718] sm:$0xff]  ;;  %v4599_v1 = vcombine.low %v528_v52, %v532_v54 }
 0x18d   : > { %3795 = vmatprep.subr.bf16.mxu0 %v4494_v7  ;;  %3959 = vmatprep.subr.bf16.mxu1 %v4496_v8  ;;  %v487_v7 = vld [vmem:[%s5285_s18 + $0x590] sm:$0xff]  ;;  %v540_v62 = vld [vmem:[%s5285_s18 + $0x738] sm:$0xff] }
 0x18e   : > { %v491_v8 = vld [vmem:[%s5285_s18 + $0x5b0] sm:$0xff] }
 0x18f   : > { %v4557_v21 = vcombine.low %v487_v7, %v491_v8 }
 0x190   : > { %3796 = vmatpush1.bf16.msra.mxu0 %v4493_v15  ;;  %3960 = vmatpush1.bf16.msra.mxu1 %v4495_v16  ;;  %v4558_v15 = vcombine.high %v487_v7, %v491_v8  ;;  %v4560_v16 = vcombine.high %v488_v10, %v492_v11  ;;  %v544_v7 = vld [vmem:[%s5285_s18 + $0x758] sm:$0xff]  ;;  %v4607_v11 = vcombine.low %v536_v61, %v540_v62 }
 0x191   : > { %3797 = vmatprep.subr.bf16.mxu0 %v4502_v17  ;;  %3961 = vmatprep.subr.bf16.mxu1 %v4504_v18  ;;  %v495_v17 = vld [vmem:[%s5285_s18 + $0x5d0] sm:$0xff]  ;;  %v548_v8 = vld [vmem:[%s5285_s18 + $0x778] sm:$0xff] }
 0x192   : > { %v499_v18 = vld [vmem:[%s5285_s18 + $0x5f0] sm:$0xff] }
 0x193   : > { %v4565_v29 = vcombine.low %v495_v17, %v499_v18 }
 0x194   : > { %3798 = vmatpush1.bf16.msra.mxu0 %v4501_v23  ;;  %3962 = vmatpush1.bf16.msra.mxu1 %v4503_v24  ;;  %v4566_v23 = vcombine.high %v495_v17, %v499_v18  ;;  %v4568_v24 = vcombine.high %v496_v19, %v500_v20  ;;  %v552_v17 = vld [vmem:[%s5285_s18 + $0x798] sm:$0xff]  ;;  %v4615_v20 = vcombine.low %v544_v7, %v548_v8 }
 0x195   : > { %3808 = vmatprep.subr.bf16.mxu0 %v4510_v26  ;;  %3972 = vmatprep.subr.bf16.mxu1 %v4512_v27  ;;  %v503_v26 = vld [vmem:[%s5285_s18 + $0x610] sm:$0xff]  ;;  %v556_v18 = vld [vmem:[%s5285_s18 + $0x7b8] sm:$0xff] }
 0x196   : > { %v507_v27 = vld [vmem:[%s5285_s18 + $0x630] sm:$0xff] }
 0x197   : > { %3800 = vmatmul.mubr.bf16.vlgmr.msra.gmra.mrb[4].mxu0 %v5393_v25  ;;  %3964 = vmatmul.mubr.bf16.vlgmr.msra.gmra.mrb[4].mxu1 %v5393_v25  ;;  %v4525_v25 = vcombine.low %v455_v37, %v459_v38  ;;  %v512_v37 = vld [vmem:[%s5285_s18 + $0x658] sm:$0xff]  ;;  %v4573_v39 = vcombine.low %v503_v26, %v507_v27 }
 0x198   : > { %3809 = vmatpush1.bf16.msra.mxu0 %v4509_v31  ;;  %3973 = vmatpush1.bf16.msra.mxu1 %v4511_v32  ;;  %v4574_v31 = vcombine.high %v503_v26, %v507_v27  ;;  %v4576_v32 = vcombine.high %v504_v59, %v508_v28  ;;  %v516_v38 = vld [vmem:[%s5285_s18 + $0x678] sm:$0xff]  ;;  %v4623_v28 = vcombine.low %v552_v17, %v556_v18 }
 0x199   : > { %3810 = vmatprep.subr.bf16.mxu0 %v4518_v33  ;;  %3974 = vmatprep.subr.bf16.mxu1 %v4520_v36  ;;  %v511_v33 = vld [vmem:[%s5285_s18 + $0x650] sm:$0xff]  ;;  %v560_v26 = vld [vmem:[%s5285_s18 + $0x7d8] sm:$0xff] }
 0x19a   : > { %3840 = vmatprep.mubr.bf16.mxu0 %v5401_v63  ;;  %4004 = vmatprep.mubr.bf16.mxu1 %v5401_v63  ;;  %v4535_v63 = vcombine.low %v464_v47, %v468_v48  ;;  %v515_v36 = vld [vmem:[%s5285_s18 + $0x670] sm:$0xff]  ;;  %v4583_v48 = vcombine.low %v512_v37, %v516_v38  ;;  %v564_v27 = vld [vmem:[%s5285_s18 + $0x7f8] sm:$0xff] }
 0x19b   : > { %v4581_v47 = vcombine.low %v511_v33, %v515_v36 }
 0x19c   : > { %3811 = vmatpush1.bf16.msra.mxu0 %v4517_v53  ;;  %3975 = vmatpush1.bf16.msra.mxu1 %v4519_v9  ;;  %v4582_v53 = vcombine.high %v511_v33, %v515_v36  ;;  %v4584_v9 = vcombine.high %v512_v37, %v516_v38  ;;  %v568_v33 = vld [vmem:[%s5285_s18 + $0x818] sm:$0xff]  ;;  %v4631_v38 = vcombine.low %v560_v26, %v564_v27 }
 0x19d   : > { %3812 = vmatprep.subr.bf16.mxu0 %v4526_v42  ;;  %3976 = vmatprep.subr.bf16.mxu1 %v4528_v43  ;;  %v519_v42 = vld [vmem:[%s5285_s18 + $0x690] sm:$0xff]  ;;  %v572_v36 = vld [vmem:[%s5285_s18 + $0x838] sm:$0xff] }
 0x19e   : > { %v523_v43 = vld [vmem:[%s5285_s18 + $0x6b0] sm:$0xff] }
 0x19f   : > { %v4589_v55 = vcombine.low %v519_v42, %v523_v43 }
 0x1a0   : > { %3813 = vmatpush1.bf16.msra.mxu0 %v4525_v25  ;;  %3977 = vmatpush1.bf16.msra.mxu1 %v4527_v49  ;;  %v4590_v25 = vcombine.high %v519_v42, %v523_v43  ;;  %v4592_v49 = vcombine.high %v520_v45, %v524_v46  ;;  %v576_v42 = vld [vmem:[%s5285_s18 + $0x858] sm:$0xff]  ;;  %v4639_v46 = vcombine.low %v568_v33, %v572_v36 }
 0x1a1   : > { %3814 = vmatprep.subr.bf16.mxu0 %v4534_v50  ;;  %3978 = vmatprep.subr.bf16.mxu1 %v4536_v51  ;;  %v527_v50 = vld [vmem:[%s5285_s18 + $0x6d0] sm:$0xff]  ;;  %v580_v43 = vld [vmem:[%s5285_s18 + $0x878] sm:$0xff] }
 0x1a2   : > { %v531_v51 = vld [vmem:[%s5285_s18 + $0x6f0] sm:$0xff] }
 0x1a3   : > { %v4597_v0 = vcombine.low %v527_v50, %v531_v51 }
 0x1a4   : > { %3815 = vmatpush1.bf16.msra.mxu0 %v4533_v57  ;;  %3979 = vmatpush1.bf16.msra.mxu1 %v4535_v63  ;;  %v4598_v57 = vcombine.high %v527_v50, %v531_v51  ;;  %v4600_v63 = vcombine.high %v528_v52, %v532_v54  ;;  %v584_v50 = vld [vmem:[%s5285_s18 + $0x898] sm:$0xff]  ;;  %v4647_v54 = vcombine.low %v576_v42, %v580_v43 }
 0x1a5   : > { %3816 = vmatprep.subr.bf16.mxu0 %v4542_v58  ;;  %3980 = vmatprep.subr.bf16.mxu1 %v4544_v60  ;;  %v535_v58 = vld [vmem:[%s5285_s18 + $0x710] sm:$0xff]  ;;  %v588_v51 = vld [vmem:[%s5285_s18 + $0x8b8] sm:$0xff] }
 0x1a6   : > { %v539_v60 = vld [vmem:[%s5285_s18 + $0x730] sm:$0xff] }
 0x1a7   : > { %v4605_v10 = vcombine.low %v535_v58, %v539_v60 }
 0x1a8   : > { %3817 = vmatpush1.bf16.msra.mxu0 %v4541_v3  ;;  %3981 = vmatpush1.bf16.msra.mxu1 %v4543_v4  ;;  %v4606_v3 = vcombine.high %v535_v58, %v539_v60  ;;  %v4608_v4 = vcombine.high %v536_v61, %v540_v62  ;;  %v592_v58 = vld [vmem:[%s5285_s18 + $0x8d8] sm:$0xff]  ;;  %v4655_v61 = vcombine.low %v584_v50, %v588_v51 }
 0x1a9   : > { %3818 = vmatprep.subr.bf16.mxu0 %v4550_v5  ;;  %3982 = vmatprep.subr.bf16.mxu1 %v4552_v6  ;;  %v543_v5 = vld [vmem:[%s5285_s18 + $0x750] sm:$0xff]  ;;  %v596_v60 = vld [vmem:[%s5285_s18 + $0x8f8] sm:$0xff] }
 0x1aa   : > { %v547_v6 = vld [vmem:[%s5285_s18 + $0x770] sm:$0xff] }
 0x1ab   : > { %v4613_v19 = vcombine.low %v543_v5, %v547_v6 }
 0x1ac   : > { %3819 = vmatpush1.bf16.msra.mxu0 %v4549_v13  ;;  %3983 = vmatpush1.bf16.msra.mxu1 %v4551_v14  ;;  %v4614_v13 = vcombine.high %v543_v5, %v547_v6  ;;  %v4616_v14 = vcombine.high %v544_v7, %v548_v8  ;;  %v604_v5 = vld [vmem:[%s5285_s18 + $0x938] sm:$0xff] }
 0x1ad   : > { %3820 = vmatprep.subr.bf16.mxu0 %v4558_v15  ;;  %3984 = vmatprep.subr.bf16.mxu1 %v4560_v16  ;;  %v551_v15 = vld [vmem:[%s5285_s18 + $0x790] sm:$0xff] }
 0x1ae   : > { %v555_v16 = vld [vmem:[%s5285_s18 + $0x7b0] sm:$0xff] }
 0x1af   : > { %v4621_v59 = vcombine.low %v551_v15, %v555_v16 }
 0x1b0   : > { %3821 = vmatpush1.bf16.msra.mxu0 %v4557_v21  ;;  %3985 = vmatpush1.bf16.msra.mxu1 %v4559_v22  ;;  %v4622_v21 = vcombine.high %v551_v15, %v555_v16  ;;  %v4624_v22 = vcombine.high %v552_v17, %v556_v18 }
 0x1b1   : > { %3822 = vmatprep.subr.bf16.mxu0 %v4566_v23  ;;  %3986 = vmatprep.subr.bf16.mxu1 %v4568_v24  ;;  %v559_v23 = vld [vmem:[%s5285_s18 + $0x7d0] sm:$0xff] }
 0x1b2   : > { %v563_v24 = vld [vmem:[%s5285_s18 + $0x7f0] sm:$0xff] }
 0x1b3   : > { %v4629_v37 = vcombine.low %v559_v23, %v563_v24 }
 0x1b4   : > { %3823 = vmatpush1.bf16.msra.mxu0 %v4565_v29  ;;  %3987 = vmatpush1.bf16.msra.mxu1 %v4567_v30  ;;  %v4630_v29 = vcombine.high %v559_v23, %v563_v24  ;;  %v4632_v30 = vcombine.high %v560_v26, %v564_v27 }
 0x1b5   : > { %3824 = vmatprep.subr.bf16.mxu0 %v4574_v31  ;;  %3988 = vmatprep.subr.bf16.mxu1 %v4576_v32  ;;  %v567_v31 = vld [vmem:[%s5285_s18 + $0x810] sm:$0xff] }
 0x1b6   : > { %v571_v32 = vld [vmem:[%s5285_s18 + $0x830] sm:$0xff] }
 0x1b7   : > { %v4637_v45 = vcombine.low %v567_v31, %v571_v32 }
 0x1b8   : > { %3825 = vmatpush1.bf16.msra.mxu0 %v4573_v39  ;;  %3989 = vmatpush1.bf16.msra.mxu1 %v4575_v41  ;;  %v4638_v39 = vcombine.high %v567_v31, %v571_v32  ;;  %v4640_v41 = vcombine.high %v568_v33, %v572_v36 }
 0x1b9   : > { %3826 = vmatprep.subr.bf16.mxu0 %v4582_v53  ;;  %3990 = vmatprep.subr.bf16.mxu1 %v4584_v9  ;;  %v575_v53 = vld [vmem:[%s5285_s18 + $0x850] sm:$0xff] }
 0x1ba   : > { %v579_v9 = vld [vmem:[%s5285_s18 + $0x870] sm:$0xff] }
 0x1bb   : > { %v4645_v52 = vcombine.low %v575_v53, %v579_v9 }
 0x1bc   : > { %3827 = vmatpush1.bf16.msra.mxu0 %v4581_v47  ;;  %3991 = vmatpush1.bf16.msra.mxu1 %v4583_v48  ;;  %v4646_v47 = vcombine.high %v575_v53, %v579_v9  ;;  %v4648_v48 = vcombine.high %v576_v42, %v580_v43 }
 0x1bd   : > { %3828 = vmatprep.subr.bf16.mxu0 %v4590_v25  ;;  %3992 = vmatprep.subr.bf16.mxu1 %v4592_v49  ;;  %v583_v25 = vld [vmem:[%s5285_s18 + $0x890] sm:$0xff] }
 0x1be   : > { %v587_v49 = vld [vmem:[%s5285_s18 + $0x8b0] sm:$0xff] }
 0x1c0   : > { %3829 = vmatpush1.bf16.msra.mxu0 %v4589_v55  ;;  %3993 = vmatpush1.bf16.msra.mxu1 %v4591_v56  ;;  %v4654_v55 = vcombine.high %v583_v25, %v587_v49  ;;  %v4656_v56 = vcombine.high %v584_v50, %v588_v51 }
 0x1c1   : > { %3830 = vmatprep.subr.bf16.mxu0 %v4598_v57  ;;  %3994 = vmatprep.subr.bf16.mxu1 %v4600_v63  ;;  %v591_v57 = vld [vmem:[%s5285_s18 + $0x8d0] sm:$0xff] }
 0x1c2   : > { %v595_v63 = vld [vmem:[%s5285_s18 + $0x8f0] sm:$0xff] }
 0x1c3   : > { %v4662_v62 = vcombine.high %v591_v57, %v595_v63  ;;  %v4661_v6 = vcombine.low %v591_v57, %v595_v63 }
 0x1c4   : > { %3831 = vmatpush1.bf16.msra.mxu0 %v4597_v0  ;;  %3995 = vmatpush1.bf16.msra.mxu1 %v4599_v1  ;;  %v4664_v0 = vcombine.high %v592_v58, %v596_v60  ;;  %v599_v1 = vld [vmem:[%s5285_s18 + $0x910] sm:$0xff] }
 0x1c5   : > { %3832 = vmatprep.subr.bf16.mxu0 %v4606_v3  ;;  %3996 = vmatprep.subr.bf16.mxu1 %v4608_v4  ;;  %v603_v3 = vld [vmem:[%s5285_s18 + $0x930] sm:$0xff]  ;;  %v600_v4 = vld [vmem:[%s5285_s18 + $0x918] sm:$0xff] }
 0x1c6   : > { %v4670_v7 = vcombine.high %v599_v1, %v603_v3  ;;  %v4672_v8 = vcombine.high %v600_v4, %v604_v5  ;;  %v4669_v15 = vcombine.low %v599_v1, %v603_v3  ;;  %v4671_v16 = vcombine.low %v600_v4, %v604_v5 }
 0x1c8   : > { %3833 = vmatpush1.bf16.msra.mxu0 %v4605_v10  ;;  %3997 = vmatpush1.bf16.msra.mxu1 %v4607_v11  ;;  %v607_v10 = vld [vmem:[%s5285_s18 + $0x950] sm:$0xff] }
 0x1c9   : > { %3834 = vmatprep.subr.bf16.mxu0 %v4614_v13  ;;  %3998 = vmatprep.subr.bf16.mxu1 %v4616_v14  ;;  %v611_v11 = vld [vmem:[%s5285_s18 + $0x970] sm:$0xff]  ;;  %v608_v13 = vld [vmem:[%s5285_s18 + $0x958] sm:$0xff] }
 0x1ca   : > { %v612_v14 = vld [vmem:[%s5285_s18 + $0x978] sm:$0xff]  ;;  %v4678_v17 = vcombine.high %v607_v10, %v611_v11  ;;  %v4677_v23 = vcombine.low %v607_v10, %v611_v11 }
 0x1cb   : > { %v4680_v18 = vcombine.high %v608_v13, %v612_v14  ;;  %v4679_v24 = vcombine.low %v608_v13, %v612_v14 }
 0x1cc   : > { %3835 = vmatpush1.bf16.msra.mxu0 %v4613_v19  ;;  %3999 = vmatpush1.bf16.msra.mxu1 %v4615_v20  ;;  %v615_v19 = vld [vmem:[%s5285_s18 + $0x990] sm:$0xff] }
 0x1cd   : > { %3836 = vmatprep.subr.bf16.mxu0 %v4622_v21  ;;  %4000 = vmatprep.subr.bf16.mxu1 %v4624_v22  ;;  %v619_v20 = vld [vmem:[%s5285_s18 + $0x9b0] sm:$0xff]  ;;  %v616_v21 = vld [vmem:[%s5285_s18 + $0x998] sm:$0xff] }
 0x1ce   : > { %v620_v22 = vld [vmem:[%s5285_s18 + $0x9b8] sm:$0xff]  ;;  %v4686_v26 = vcombine.high %v615_v19, %v619_v20  ;;  %v4685_v31 = vcombine.low %v615_v19, %v619_v20 }
 0x1cf   : > { %v4688_v27 = vcombine.high %v616_v21, %v620_v22  ;;  %v4687_v32 = vcombine.low %v616_v21, %v620_v22 }
 0x1d0   : > { %3837 = vmatpush1.bf16.msra.mxu0 %v4621_v59  ;;  %4001 = vmatpush1.bf16.msra.mxu1 %v4623_v28  ;;  %v623_v59 = vld [vmem:[%s5285_s18 + $0x9d0] sm:$0xff] }
 0x1d1   : > { %3838 = vmatprep.subr.bf16.mxu0 %v4630_v29  ;;  %4002 = vmatprep.subr.bf16.mxu1 %v4632_v30  ;;  %v627_v28 = vld [vmem:[%s5285_s18 + $0x9f0] sm:$0xff]  ;;  %v624_v29 = vld [vmem:[%s5285_s18 + $0x9d8] sm:$0xff] }
 0x1d2   : > { %v628_v30 = vld [vmem:[%s5285_s18 + $0x9f8] sm:$0xff]  ;;  %v4694_v33 = vcombine.high %v623_v59, %v627_v28  ;;  %v4693_v53 = vcombine.low %v623_v59, %v627_v28 }
 0x1d3   : > { %v4696_v36 = vcombine.high %v624_v29, %v628_v30  ;;  %v4695_v9 = vcombine.low %v624_v29, %v628_v30 }
 0x1d4   : > { %3839 = vmatpush1.bf16.msra.mxu0 %v4629_v37  ;;  %4003 = vmatpush1.bf16.msra.mxu1 %v4631_v38  ;;  %v631_v37 = vld [vmem:[%s5285_s18 + $0xa10] sm:$0xff] }
 0x1d5   : > { %3849 = vmatprep.subr.bf16.mxu0 %v4638_v39  ;;  %4013 = vmatprep.subr.bf16.mxu1 %v4640_v41  ;;  %v635_v38 = vld [vmem:[%s5285_s18 + $0xa30] sm:$0xff]  ;;  %v632_v39 = vld [vmem:[%s5285_s18 + $0xa18] sm:$0xff] }
 0x1d6   : > { %v636_v41 = vld [vmem:[%s5285_s18 + $0xa38] sm:$0xff]  ;;  %v4702_v42 = vcombine.high %v631_v37, %v635_v38 }
 0x1d7   : > { %3841 = vmatmul.mubr.bf16.vlgmr.msra.gmra.mrb[4].mxu0 %v5475_v40  ;;  %4005 = vmatmul.mubr.bf16.vlgmr.msra.gmra.mrb[4].mxu1 %v5475_v40  ;;  %v4653_v40 = vcombine.low %v583_v25, %v587_v49  ;;  %v4704_v43 = vcombine.high %v632_v39, %v636_v41  ;;  %v4701_v25 = vcombine.low %v631_v37, %v635_v38 }
 0x1d8   : > { %3850 = vmatpush1.bf16.msra.mxu0 %v4637_v45  ;;  %4014 = vmatpush1.bf16.msra.mxu1 %v4639_v46  ;;  %v639_v45 = vld [vmem:[%s5285_s18 + $0xa50] sm:$0xff]  ;;  %v4703_v49 = vcombine.low %v632_v39, %v636_v41 }
 0x1d9   : > { %3851 = vmatprep.subr.bf16.mxu0 %v4646_v47  ;;  %4015 = vmatprep.subr.bf16.mxu1 %v4648_v48  ;;  %v643_v46 = vld [vmem:[%s5285_s18 + $0xa70] sm:$0xff]  ;;  %v640_v47 = vld [vmem:[%s5285_s18 + $0xa58] sm:$0xff] }
 0x1da   : > { %3881 = vmatprep.mubr.bf16.mxu0 %v5404_v34  ;;  %4045 = vmatprep.mubr.bf16.mxu1 %v5404_v34  ;;  %v4663_v34 = vcombine.low %v592_v58, %v596_v60  ;;  %v644_v48 = vld [vmem:[%s5285_s18 + $0xa78] sm:$0xff]  ;;  %v4710_v50 = vcombine.high %v639_v45, %v643_v46  ;;  %v4709_v57 = vcombine.low %v639_v45, %v643_v46 }
 0x1db   : > { %v4712_v51 = vcombine.high %v640_v47, %v644_v48  ;;  %v4711_v63 = vcombine.low %v640_v47, %v644_v48 }
 0x1dc   : > { %3852 = vmatpush1.bf16.msra.mxu0 %v4645_v52  ;;  %4016 = vmatpush1.bf16.msra.mxu1 %v4647_v54  ;;  %v647_v52 = vld [vmem:[%s5285_s18 + $0xa90] sm:$0xff] }
 0x1dd   : > { %3853 = vmatprep.subr.bf16.mxu0 %v4654_v55  ;;  %4017 = vmatprep.subr.bf16.mxu1 %v4656_v56  ;;  %v651_v54 = vld [vmem:[%s5285_s18 + $0xab0] sm:$0xff]  ;;  %v648_v55 = vld [vmem:[%s5285_s18 + $0xa98] sm:$0xff] }
 0x1de   : > { %v652_v56 = vld [vmem:[%s5285_s18 + $0xab8] sm:$0xff]  ;;  %v4718_v58 = vcombine.high %v647_v52, %v651_v54  ;;  %v4717_v1 = vcombine.low %v647_v52, %v651_v54 }
 0x1df   : > { %v4720_v60 = vcombine.high %v648_v55, %v652_v56  ;;  %v4719_v3 = vcombine.low %v648_v55, %v652_v56 }
 0x1e0   : > { %3854 = vmatpush1.bf16.msra.mxu0 %v4653_v40  ;;  %4018 = vmatpush1.bf16.msra.mxu1 %v4655_v61  ;;  %v655_v40 = vld [vmem:[%s5285_s18 + $0xad0] sm:$0xff] }
 0x1e1   : > { %3855 = vmatprep.subr.bf16.mxu0 %v4662_v62  ;;  %4019 = vmatprep.subr.bf16.mxu1 %v4664_v0  ;;  %v659_v61 = vld [vmem:[%s5285_s18 + $0xaf0] sm:$0xff]  ;;  %v656_v62 = vld [vmem:[%s5285_s18 + $0xad8] sm:$0xff] }
 0x1e2   : > { %v660_v0 = vld [vmem:[%s5285_s18 + $0xaf8] sm:$0xff]  ;;  %v4726_v4 = vcombine.high %v655_v40, %v659_v61  ;;  %v4725_v10 = vcombine.low %v655_v40, %v659_v61 }
 0x1e3   : > { %v4728_v5 = vcombine.high %v656_v62, %v660_v0  ;;  %v4727_v11 = vcombine.low %v656_v62, %v660_v0 }
 0x1e4   : > { %3856 = vmatpush1.bf16.msra.mxu0 %v4661_v6  ;;  %4020 = vmatpush1.bf16.msra.mxu1 %v4663_v34  ;;  %v663_v6 = vld [vmem:[%s5285_s18 + $0xb10] sm:$0xff] }
 0x1e5   : > { %3857 = vmatprep.subr.bf16.mxu0 %v4670_v7  ;;  %4021 = vmatprep.subr.bf16.mxu1 %v4672_v8  ;;  %v667_v34 = vld [vmem:[%s5285_s18 + $0xb30] sm:$0xff]  ;;  %v664_v7 = vld [vmem:[%s5285_s18 + $0xb18] sm:$0xff] }
 0x1e6   : > { %v668_v8 = vld [vmem:[%s5285_s18 + $0xb38] sm:$0xff]  ;;  %v4734_v13 = vcombine.high %v663_v6, %v667_v34  ;;  %v4733_v19 = vcombine.low %v663_v6, %v667_v34 }
 0x1e7   : > { %v4736_v14 = vcombine.high %v664_v7, %v668_v8  ;;  %v4735_v20 = vcombine.low %v664_v7, %v668_v8  ;;  %v727_v8 = vld [vmem:[%s5285_s18 + $0xd10] sm:$0xff] }
 0x1e8   : > { %3858 = vmatpush1.bf16.msra.mxu0 %v4669_v15  ;;  %4022 = vmatpush1.bf16.msra.mxu1 %v4671_v16  ;;  %v671_v15 = vld [vmem:[%s5285_s18 + $0xb50] sm:$0xff] }
 0x1e9   : > { %3859 = vmatprep.subr.bf16.mxu0 %v4678_v17  ;;  %4023 = vmatprep.subr.bf16.mxu1 %v4680_v18  ;;  %v675_v16 = vld [vmem:[%s5285_s18 + $0xb70] sm:$0xff]  ;;  %v672_v17 = vld [vmem:[%s5285_s18 + $0xb58] sm:$0xff] }
 0x1ea   : > { %v676_v18 = vld [vmem:[%s5285_s18 + $0xb78] sm:$0xff]  ;;  %v4742_v21 = vcombine.high %v671_v15, %v675_v16  ;;  %v4741_v59 = vcombine.low %v671_v15, %v675_v16 }
 0x1eb   : > { %v4744_v22 = vcombine.high %v672_v17, %v676_v18  ;;  %v4743_v28 = vcombine.low %v672_v17, %v676_v18  ;;  %v5129_v17 = vmov 1983009808  }
 0x1ec   : > { %3860 = vmatpush1.bf16.msra.mxu0 %v4677_v23  ;;  %4024 = vmatpush1.bf16.msra.mxu1 %v4679_v24  ;;  %v679_v23 = vld [vmem:[%s5285_s18 + $0xb90] sm:$0xff]  ;;  %v4106_v18 = vunpack.c.l.s4 %v5129_v17 }
 0x1ed   : > { %3861 = vmatprep.subr.bf16.mxu0 %v4686_v26  ;;  %4025 = vmatprep.subr.bf16.mxu1 %v4688_v27  ;;  %v683_v24 = vld [vmem:[%s5285_s18 + $0xbb0] sm:$0xff]  ;;  %v680_v26 = vld [vmem:[%s5285_s18 + $0xb98] sm:$0xff] }
 0x1ee   : > { %v684_v27 = vld [vmem:[%s5285_s18 + $0xbb8] sm:$0xff]  ;;  %v4750_v29 = vcombine.high %v679_v23, %v683_v24  ;;  %v4749_v37 = vcombine.low %v679_v23, %v683_v24 }
 0x1ef   : > { %v4752_v30 = vcombine.high %v680_v26, %v684_v27  ;;  %v4751_v38 = vcombine.low %v680_v26, %v684_v27  ;;  %v4107_v27 = vunpack.c.0.s8 %v4106_v18 }
 0x1f0   : > { %3862 = vmatpush1.bf16.msra.mxu0 %v4685_v31  ;;  %4026 = vmatpush1.bf16.msra.mxu1 %v4687_v32  ;;  %v687_v31 = vld [vmem:[%s5285_s18 + $0xbd0] sm:$0xff] }
 0x1f1   : > { %3863 = vmatprep.subr.bf16.mxu0 %v4694_v33  ;;  %4027 = vmatprep.subr.bf16.mxu1 %v4696_v36  ;;  %v691_v32 = vld [vmem:[%s5285_s18 + $0xbf0] sm:$0xff]  ;;  %v688_v33 = vld [vmem:[%s5285_s18 + $0xbd8] sm:$0xff] }
 0x1f2   : > { %v692_v36 = vld [vmem:[%s5285_s18 + $0xbf8] sm:$0xff]  ;;  %v4758_v39 = vcombine.high %v687_v31, %v691_v32  ;;  %v4757_v45 = vcombine.low %v687_v31, %v691_v32 }
 0x1f3   : > { %v4760_v41 = vcombine.high %v688_v33, %v692_v36  ;;  %v4759_v46 = vcombine.low %v688_v33, %v692_v36  ;;  %v748_v31 = vld [vmem:[%s5285_s18 + $0xdb8] sm:$0xff] }
 0x1f4   : > { %3864 = vmatpush1.bf16.msra.mxu0 %v4693_v53  ;;  %4028 = vmatpush1.bf16.msra.mxu1 %v4695_v9  ;;  %v695_v53 = vld [vmem:[%s5285_s18 + $0xc10] sm:$0xff] }
 0x1f5   : > { %3865 = vmatprep.subr.bf16.mxu0 %v4702_v42  ;;  %4029 = vmatprep.subr.bf16.mxu1 %v4704_v43  ;;  %v699_v9 = vld [vmem:[%s5285_s18 + $0xc30] sm:$0xff]  ;;  %v696_v42 = vld [vmem:[%s5285_s18 + $0xc18] sm:$0xff] }
 0x1f6   : > { %v700_v43 = vld [vmem:[%s5285_s18 + $0xc38] sm:$0xff]  ;;  %v4766_v47 = vcombine.high %v695_v53, %v699_v9  ;;  %v4765_v52 = vcombine.low %v695_v53, %v699_v9  ;;  %v755_v53 = vld [vmem:[%s5285_s18 + $0xdf0] sm:$0xff] }
 0x1f7   : > { %v4768_v48 = vcombine.high %v696_v42, %v700_v43  ;;  %v4767_v54 = vcombine.low %v696_v42, %v700_v43  ;;  %v752_v43 = vld [vmem:[%s5285_s18 + $0xdd8] sm:$0xff] }
 0x1f8   : > { %3866 = vmatpush1.bf16.msra.mxu0 %v4701_v25  ;;  %4030 = vmatpush1.bf16.msra.mxu1 %v4703_v49  ;;  %v703_v25 = vld [vmem:[%s5285_s18 + $0xc50] sm:$0xff] }
 0x1f9   : > { %3867 = vmatprep.subr.bf16.mxu0 %v4710_v50  ;;  %4031 = vmatprep.subr.bf16.mxu1 %v4712_v51  ;;  %v707_v49 = vld [vmem:[%s5285_s18 + $0xc70] sm:$0xff]  ;;  %v704_v50 = vld [vmem:[%s5285_s18 + $0xc58] sm:$0xff] }
 0x1fa   : > { %v708_v51 = vld [vmem:[%s5285_s18 + $0xc78] sm:$0xff]  ;;  %v4774_v55 = vcombine.high %v703_v25, %v707_v49  ;;  %v4773_v40 = vcombine.low %v703_v25, %v707_v49 }
 0x1fb   : > { %v4776_v56 = vcombine.high %v704_v50, %v708_v51  ;;  %v4775_v61 = vcombine.low %v704_v50, %v708_v51 }
 0x1fc   : > { %3868 = vmatpush1.bf16.msra.mxu0 %v4709_v57  ;;  %4032 = vmatpush1.bf16.msra.mxu1 %v4711_v63  ;;  %v711_v57 = vld [vmem:[%s5285_s18 + $0xc90] sm:$0xff] }
 0x1fd   : > { %3869 = vmatprep.subr.bf16.mxu0 %v4718_v58  ;;  %4033 = vmatprep.subr.bf16.mxu1 %v4720_v60  ;;  %v715_v63 = vld [vmem:[%s5285_s18 + $0xcb0] sm:$0xff]  ;;  %v712_v58 = vld [vmem:[%s5285_s18 + $0xc98] sm:$0xff] }
 0x1fe   : > { %v716_v60 = vld [vmem:[%s5285_s18 + $0xcb8] sm:$0xff]  ;;  %v4782_v62 = vcombine.high %v711_v57, %v715_v63 }
 0x1ff   : > { %v4784_v0 = vcombine.high %v712_v58, %v716_v60  ;;  %v4783_v6 = vcombine.low %v712_v58, %v716_v60  ;;  %v763_v58 = vld [vmem:[%s5285_s18 + $0xe30] sm:$0xff] }
 0x200   : > { %3870 = vmatpush1.bf16.msra.mxu0 %v4717_v1  ;;  %4034 = vmatpush1.bf16.msra.mxu1 %v4719_v3  ;;  %v719_v1 = vld [vmem:[%s5285_s18 + $0xcd0] sm:$0xff] }
 0x201   : > { %3871 = vmatprep.subr.bf16.mxu0 %v4726_v4  ;;  %4035 = vmatprep.subr.bf16.mxu1 %v4728_v5  ;;  %v723_v3 = vld [vmem:[%s5285_s18 + $0xcf0] sm:$0xff]  ;;  %v720_v4 = vld [vmem:[%s5285_s18 + $0xcd8] sm:$0xff] }
 0x202   : > { %v724_v5 = vld [vmem:[%s5285_s18 + $0xcf8] sm:$0xff]  ;;  %v4790_v34 = vcombine.high %v719_v1, %v723_v3 }
 0x203   : > { %v4792_v7 = vcombine.high %v720_v4, %v724_v5 }
 0x204   : > { %3872 = vmatpush1.bf16.msra.mxu0 %v4725_v10  ;;  %4036 = vmatpush1.bf16.msra.mxu1 %v4727_v11  ;;  %v731_v10 = vld [vmem:[%s5285_s18 + $0xd30] sm:$0xff]  ;;  %v728_v11 = vld [vmem:[%s5285_s18 + $0xd18] sm:$0xff] }
 0x205   : > { %3873 = vmatprep.subr.bf16.mxu0 %v4734_v13  ;;  %4037 = vmatprep.subr.bf16.mxu1 %v4736_v14  ;;  %v732_v13 = vld [vmem:[%s5285_s18 + $0xd38] sm:$0xff]  ;;  %v4789_v14 = vcombine.low %v719_v1, %v723_v3  ;;  %v4798_v15 = vcombine.high %v727_v8, %v731_v10  ;;  %v4797_v23 = vcombine.low %v727_v8, %v731_v10 }
 0x206   : > { %v4800_v16 = vcombine.high %v728_v11, %v732_v13  ;;  %v4799_v24 = vcombine.low %v728_v11, %v732_v13  ;;  %v775_v13 = vld [vmem:[%s5285_s18 + $0xe90] sm:$0xff] }
 0x208   : > { %3874 = vmatpush1.bf16.msra.mxu0 %v4733_v19  ;;  %4038 = vmatpush1.bf16.msra.mxu1 %v4735_v20  ;;  %v735_v19 = vld [vmem:[%s5285_s18 + $0xd50] sm:$0xff] }
 0x209   : > { %3875 = vmatprep.subr.bf16.mxu0 %v4742_v21  ;;  %4039 = vmatprep.subr.bf16.mxu1 %v4744_v22  ;;  %v739_v20 = vld [vmem:[%s5285_s18 + $0xd70] sm:$0xff]  ;;  %v736_v21 = vld [vmem:[%s5285_s18 + $0xd58] sm:$0xff] }
 0x20a   : > { %v740_v22 = vld [vmem:[%s5285_s18 + $0xd78] sm:$0xff]  ;;  %v4806_v26 = vcombine.high %v735_v19, %v739_v20  ;;  %v4805_v32 = vcombine.low %v735_v19, %v739_v20  ;;  %v783_v20 = vld [vmem:[%s5285_s18 + $0xed0] sm:$0xff] }
 0x20b   : > { %v4807_v33 = vcombine.low %v736_v21, %v740_v22 }
 0x20c   : > { %3876 = vmatpush1.bf16.msra.mxu0 %v4741_v59  ;;  %4040 = vmatpush1.bf16.msra.mxu1 %v4743_v28  ;;  %v4808_v59 = vcombine.high %v736_v21, %v740_v22  ;;  %v743_v28 = vld [vmem:[%s5285_s18 + $0xd90] sm:$0xff]  ;;  %v784_v22 = vld [vmem:[%s5285_s18 + $0xed8] sm:$0xff] }
 0x20d   : > { %3877 = vmatprep.subr.bf16.mxu0 %v4750_v29  ;;  %4041 = vmatprep.subr.bf16.mxu1 %v4752_v30  ;;  %v747_v29 = vld [vmem:[%s5285_s18 + $0xdb0] sm:$0xff]  ;;  %v744_v30 = vld [vmem:[%s5285_s18 + $0xd98] sm:$0xff] }
 0x20e   : > { %v4814_v36 = vcombine.high %v743_v28, %v747_v29  ;;  %v4813_v25 = vcombine.low %v743_v28, %v747_v29  ;;  %v787_v21 = vld [vmem:[%s5285_s18 + $0xef0] sm:$0xff] }
 0x20f   : > { %v791_v28 = vld [vmem:[%s5285_s18 + $0xf10] sm:$0xff] }
 0x210   : > { %3878 = vmatpush1.bf16.msra.mxu0 %v4749_v37  ;;  %4042 = vmatpush1.bf16.msra.mxu1 %v4751_v38  ;;  %v5852_v38 = vsub.s32 %v4107_v27, %v5319_v44  ;;  %v4854_v27 = vcombine.high %v783_v20, %v787_v21  ;;  %v795_v29 = vld [vmem:[%s5285_s18 + $0xf30] sm:$0xff] }
 0x211   : > { %3879 = vmatprep.subr.bf16.mxu0 %v4758_v39  ;;  %4043 = vmatprep.subr.bf16.mxu1 %v4760_v41  ;;  %v4816_v39 = vcombine.high %v744_v30, %v748_v31  ;;  %v751_v41 = vld [vmem:[%s5285_s18 + $0xdd0] sm:$0xff] }
 0x214   : > { %3880 = vmatpush1.bf16.msra.mxu0 %v4757_v45  ;;  %4044 = vmatpush1.bf16.msra.mxu1 %v4759_v46  ;;  %v756_v45 = vld [vmem:[%s5285_s18 + $0xdf8] sm:$0xff] }
 0x215   : > { %3890 = vmatprep.subr.bf16.mxu0 %v4766_v47  ;;  %4054 = vmatprep.subr.bf16.mxu1 %v4768_v48  ;;  %v4823_v1 = vcombine.low %v752_v43, %v756_v45 }
 0x217   : > { %3882 = vmatmul.mubr.bf16.vlgmr.msra.gmra.mrb[4].mxu0 %v5407_v35  ;;  %4046 = vmatmul.mubr.bf16.vlgmr.msra.gmra.mrb[4].mxu1 %v5407_v35  ;;  %v4781_v35 = vcombine.low %v711_v57, %v715_v63  ;;  %v4824_v57 = vcombine.high %v752_v43, %v756_v45  ;;  %v759_v63 = vld [vmem:[%s5285_s18 + $0xe10] sm:$0xff] }
 0x218   : > { %3891 = vmatpush1.bf16.msra.mxu0 %v4765_v52  ;;  %4055 = vmatpush1.bf16.msra.mxu1 %v4767_v54  ;;  %v4815_v52 = vcombine.low %v744_v30, %v748_v31  ;;  %v4822_v54 = vcombine.high %v751_v41, %v755_v53  ;;  %v4830_v3 = vcombine.high %v759_v63, %v763_v58  ;;  %v792_v30 = vld [vmem:[%s5285_s18 + $0xf18] sm:$0xff] }
 0x219   : > { %3892 = vmatprep.subr.bf16.mxu0 %v4774_v55  ;;  %4056 = vmatprep.subr.bf16.mxu1 %v4776_v56  ;;  %v796_v31 = vld [vmem:[%s5285_s18 + $0xf38] sm:$0xff] }
 0x21a   : > { %3922 = vmatprep.mubr.bf16.mxu0 %v5551_v2  ;;  %4086 = vmatprep.mubr.bf16.mxu1 %v5551_v2  ;;  %v4791_v2 = vcombine.low %v720_v4, %v724_v5  ;;  %v767_v5 = vld [vmem:[%s5285_s18 + $0xe50] sm:$0xff]  ;;  %v4863_v43 = vcombine.low %v792_v30, %v796_v31 }
 0x21c   : > { %3893 = vmatpush1.bf16.msra.mxu0 %v4773_v40  ;;  %4057 = vmatpush1.bf16.msra.mxu1 %v4775_v61  ;;  %v760_v40 = vld [vmem:[%s5285_s18 + $0xe18] sm:$0xff] }
 0x21d   : > { %3894 = vmatprep.subr.bf16.mxu0 %v4782_v62  ;;  %4058 = vmatprep.subr.bf16.mxu1 %v4784_v0  ;;  %v764_v61 = vld [vmem:[%s5285_s18 + $0xe38] sm:$0xff]  ;;  %v4821_v62 = vcombine.low %v751_v41, %v755_v53  ;;  %v803_v41 = vld [vmem:[%s5285_s18 + $0xf70] sm:$0xff] }
 0x21e   : > { %v4832_v4 = vcombine.high %v760_v40, %v764_v61  ;;  %v4831_v8 = vcombine.low %v760_v40, %v764_v61  ;;  %v800_v53 = vld [vmem:[%s5285_s18 + $0xf58] sm:$0xff] }
 0x220   : > { %3895 = vmatpush1.bf16.msra.mxu0 %v4781_v35  ;;  %4059 = vmatpush1.bf16.msra.mxu1 %v4783_v6  ;;  %v771_v35 = vld [vmem:[%s5285_s18 + $0xe70] sm:$0xff]  ;;  %v768_v6 = vld [vmem:[%s5285_s18 + $0xe58] sm:$0xff] }
 0x221   : > { %3896 = vmatprep.subr.bf16.mxu0 %v4790_v34  ;;  %4060 = vmatprep.subr.bf16.mxu1 %v4792_v7  ;;  %v772_v34 = vld [vmem:[%s5285_s18 + $0xe78] sm:$0xff]  ;;  %v4829_v7 = vcombine.low %v759_v63, %v763_v58  ;;  %v4838_v10 = vcombine.high %v767_v5, %v771_v35 }
 0x222   : > { %v4840_v11 = vcombine.high %v768_v6, %v772_v34  ;;  %v4839_v17 = vcombine.low %v768_v6, %v772_v34  ;;  %v816_v63 = vld [vmem:[%s5285_s18 + $0xfd8] sm:$0xff]  ;;  %v4160_v6 = vsub.s32 2, %v5319_v44  ;;  %v4164_v34 = vsub.s32 3, %v5319_v44 }
 0x223   : > { %v820_v58 = vld [vmem:[%s5285_s18 + $0xff8] sm:$0xff] }
 0x224   : > { %3897 = vmatpush1.bf16.msra.mxu0 %v4789_v14  ;;  %4061 = vmatpush1.bf16.msra.mxu1 %v4791_v2  ;;  %v779_v14 = vld [vmem:[%s5285_s18 + $0xeb0] sm:$0xff]  ;;  %v776_v2 = vld [vmem:[%s5285_s18 + $0xe98] sm:$0xff] }
 0x225   : > { %3898 = vmatprep.subr.bf16.mxu0 %v4798_v15  ;;  %4062 = vmatprep.subr.bf16.mxu1 %v4800_v16  ;;  %v780_v15 = vld [vmem:[%s5285_s18 + $0xeb8] sm:$0xff]  ;;  %v4837_v16 = vcombine.low %v767_v5, %v771_v35  ;;  %v4846_v18 = vcombine.high %v775_v13, %v779_v14  ;;  %v4152_v5 = vsub.s32 0, %v5319_v44  ;;  %v4156_v35 = vsub.s32 1, %v5319_v44 }
 0x226   : > { %v4848_v19 = vcombine.high %v776_v2, %v780_v15 }
 0x228   : > { %3899 = vmatpush1.bf16.msra.mxu0 %v4797_v23  ;;  %4063 = vmatpush1.bf16.msra.mxu1 %v4799_v24  ;;  %v788_v23 = vld [vmem:[%s5285_s18 + $0xef8] sm:$0xff]  ;;  %v4845_v24 = vcombine.low %v775_v13, %v779_v14  ;;  %v4180_v13 = vsub.s32 7, %v5319_v44 }
 0x229   : > { %3900 = vmatprep.subr.bf16.mxu0 %v4806_v26  ;;  %4064 = vmatprep.subr.bf16.mxu1 %v4808_v59  ;;  %v4847_v26 = vcombine.low %v776_v2, %v780_v15  ;;  %v4856_v59 = vcombine.high %v784_v22, %v788_v23 }
 0x22a   : > { %v3596_v37 = vpop.f32.mrb[0].mxu0  ;;  %v3760_v9 = vpop.f32.mrb[0].mxu1 }
 0x22b   : > { %v3598_v42 = vpop.f32.mrb[1].mxu0  ;;  %v3762_v47 = vpop.f32.mrb[1].mxu1 }
 0x22c   : > { %v4103_v46 = vcombine.low %v3596_v37, %v3598_v42  ;;  %v3600_v48 = vpop.f32.mrb[2].mxu0  ;;  %3901 = vmatpush1.bf16.msra.mxu0 %v4805_v32  ;;  %v4104_v49 = vcombine.low %v3760_v9, %v3762_v47  ;;  %v3764_v50 = vpop.f32.mrb[2].mxu1  ;;  %4065 = vmatpush1.bf16.msra.mxu1 %v4807_v33  ;;  %v4853_v32 = vcombine.low %v783_v20, %v787_v21  ;;  %v804_v9 = vld [vmem:[%s5285_s18 + $0xf78] sm:$0xff]  ;;  %v807_v47 = vld [vmem:[%s5285_s18 + $0xf90] sm:$0xff] }
 0x22d   : > { %v3601_v51 = vpop.f32.mrb[3].mxu0  ;;  %3902 = vmatprep.subr.bf16.mxu0 %v4814_v36  ;;  %v3765_v56 = vpop.f32.mrb[3].mxu1  ;;  %4066 = vmatprep.subr.bf16.mxu1 %v4816_v39  ;;  %v4855_v33 = vcombine.low %v784_v22, %v788_v23  ;;  %v4862_v36 = vcombine.high %v791_v28, %v795_v29  ;;  %v4864_v37 = vcombine.high %v792_v30, %v796_v31  ;;  %v799_v39 = vld [vmem:[%s5285_s18 + $0xf50] sm:$0xff] }
 0x22e   : > { %v5859_v55 = vrot.slane %v4103_v46, %v5852_v38  ;;  %v5864_v60 = vrot.slane %v4104_v49, %v5852_v38  ;;  %v4861_v42 = vcombine.low %v791_v28, %v795_v29  ;;  %v4870_v45 = vcombine.high %v799_v39, %v803_v41  ;;  %v811_v48 = vld [vmem:[%s5285_s18 + $0xfb0] sm:$0xff]  ;;  %v812_v49 = vld [vmem:[%s5285_s18 + $0xfb8] sm:$0xff] }
 0x22f   : > { %v4872_v46 = vcombine.high %v800_v53, %v804_v9  ;;  %v4869_v50 = vcombine.low %v799_v39, %v803_v41  ;;  %v4871_v51 = vcombine.low %v800_v53, %v804_v9  ;;  %v815_v56 = vld [vmem:[%s5285_s18 + $0xfd0] sm:$0xff]  ;;  %v4877_v40 = vcombine.low %v807_v47, %v811_v48 }
 0x230   : > { %3903 = vmatpush1.bf16.msra.mxu0 %v4813_v25  ;;  %v4119_v0 = vcombine.low %v5859_v55, %v5864_v60  ;;  %4067 = vmatpush1.bf16.msra.mxu1 %v4815_v52  ;;  %v808_v25 = vld [vmem:[%s5285_s18 + $0xf98] sm:$0xff]  ;;  %v4878_v52 = vcombine.high %v807_v47, %v811_v48 }
 0x231   : > { %3904 = vmatprep.subr.bf16.mxu0 %v4822_v54  ;;  %4068 = vmatprep.subr.bf16.mxu1 %v4824_v57  ;;  %v4880_v54 = vcombine.high %v808_v25, %v812_v49  ;;  %v819_v57 = vld [vmem:[%s5285_s18 + $0xff0] sm:$0xff]  ;;  %v4879_v61 = vcombine.low %v808_v25, %v812_v49 }
 0x234   : > { %3905 = vmatpush1.bf16.msra.mxu0 %v4821_v62  ;;  %4069 = vmatpush1.bf16.msra.mxu1 %v4823_v1  ;;  %v4886_v62 = vcombine.high %v815_v56, %v819_v57  ;;  %v4888_v1 = vcombine.high %v816_v63, %v820_v58 }
 0x235   : > { %3906 = vmatprep.subr.bf16.mxu0 %v4830_v3  ;;  %4070 = vmatprep.subr.bf16.mxu1 %v4832_v4  ;;  %v4885_v3 = vcombine.low %v815_v56, %v819_v57  ;;  %v4887_v4 = vcombine.low %v816_v63, %v820_v58 }
 0x238   : > { %3907 = vmatpush1.bf16.msra.mxu0 %v4829_v7  ;;  %4071 = vmatpush1.bf16.msra.mxu1 %v4831_v8  ;;  %v4148_v7 = vld [vmem:[%s5291_s7] sm:$0xff]  ;;  %v4168_v8 = vsub.s32 4, %v5319_v44 }
 0x239   : > { %3908 = vmatprep.subr.bf16.mxu0 %v4838_v10  ;;  %4072 = vmatprep.subr.bf16.mxu1 %v4840_v11  ;;  %v4172_v10 = vsub.s32 5, %v5319_v44  ;;  %v4176_v11 = vsub.s32 6, %v5319_v44  ;;  %v4153_v14 = vrot.slane %v4148_v7, %v4152_v5  ;;  %v4161_v2 = vrot.slane %v4148_v7, %v4160_v6 }
 0x23a   : > { %v4165_v15 = vrot.slane %v4148_v7, %v4164_v34 }
 0x23c   : > { %3909 = vmatpush1.bf16.msra.mxu0 %v4837_v16  ;;  %4073 = vmatpush1.bf16.msra.mxu1 %v4839_v17  ;;  %v4169_v16 = vrot.slane %v4148_v7, %v4168_v8  ;;  %v4173_v17 = vrot.slane %v4148_v7, %v4172_v10  ;;  %v4183_v21 = vcombine.low %v4161_v2, %v4165_v15 }
 0x23d   : > { %3910 = vmatprep.subr.bf16.mxu0 %v4846_v18  ;;  %4074 = vmatprep.subr.bf16.mxu1 %v4848_v19  ;;  %v4177_v18 = vrot.slane %v4148_v7, %v4176_v11  ;;  %v4181_v19 = vrot.slane %v4148_v7, %v4180_v13 }
 0x23e   : > { %v4199_v22 = vcombine.low %v4169_v16, %v4173_v17 }
 0x23f   : > { %v4200_v23 = vcombine.low %v4177_v18, %v4181_v19 }
 0x240   : > { %3911 = vmatpush1.bf16.msra.mxu0 %v4845_v24  ;;  %4075 = vmatpush1.bf16.msra.mxu1 %v4847_v26  ;;  %v4207_v28 = vrot.slane %v4199_v22, %v5852_v38 }
 0x241   : > { %3912 = vmatprep.subr.bf16.mxu0 %v4854_v27  ;;  %4076 = vmatprep.subr.bf16.mxu1 %v4856_v59  ;;  %v4197_v27 = vrot.slane %v4183_v21, %v5852_v38  ;;  %v4214_v29 = vrot.slane %v4200_v23, %v5852_v38 }
 0x244   : > { %3913 = vmatpush1.bf16.msra.mxu0 %v4853_v32  ;;  %4077 = vmatpush1.bf16.msra.mxu1 %v4855_v33 }
 0x245   : > { %3914 = vmatprep.subr.bf16.mxu0 %v4862_v36  ;;  %4078 = vmatprep.subr.bf16.mxu1 %v4864_v37 }
 0x248   : > { %3915 = vmatpush1.bf16.msra.mxu0 %v4861_v42  ;;  %4079 = vmatpush1.bf16.msra.mxu1 %v4863_v43  ;;  %v4215_v42 = vcombine.low %v4207_v28, %v4214_v29 }
 0x249   : > { %3916 = vmatprep.subr.bf16.mxu0 %v4870_v45  ;;  %4080 = vmatprep.subr.bf16.mxu1 %v4872_v46 }
 0x24c   : > { %3917 = vmatpush1.bf16.msra.mxu0 %v4869_v50  ;;  %4081 = vmatpush1.bf16.msra.mxu1 %v4871_v51 }
 0x24d   : > { %3918 = vmatprep.subr.bf16.mxu0 %v4878_v52  ;;  %4082 = vmatprep.subr.bf16.mxu1 %v4880_v54 }
 0x250   : > { %3919 = vmatpush1.bf16.msra.mxu0 %v4877_v40  ;;  %4083 = vmatpush1.bf16.msra.mxu1 %v4879_v61 }
 0x251   : > { %3920 = vmatprep.subr.bf16.mxu0 %v4886_v62  ;;  %4084 = vmatprep.subr.bf16.mxu1 %v4888_v1 }
 0x254   : > { %3921 = vmatpush1.bf16.msra.mxu0 %v4885_v3  ;;  %4085 = vmatpush1.bf16.msra.mxu1 %v4887_v4 }
 0x257   : > { %3923 = vmatmul.mubr.bf16.vlgmr.msra.gmra.mrb[4].mxu0 %v5619_v12  ;;  %4087 = vmatmul.mubr.bf16.vlgmr.msra.gmra.mrb[4].mxu1 %v5619_v12  ;;  %v4157_v12 = vrot.slane %v4148_v7, %v4156_v35 }
 0x259   : > { %v4182_v20 = vcombine.low %v4153_v14, %v4157_v12 }
 0x25b   : > { %v4190_v26 = vrot.slane %v4182_v20, %v5852_v38 }
 0x25d   : > { %v4198_v53 = vcombine.low %v4190_v26, %v4197_v27 }
 0x25f   : > { %v4218_v45 = vadd.f32 %v4198_v53, %v4119_v0 }
 0x32a   : > { %v3924_v24 = vpop.f32.mrb[4].mxu0  ;;  %v4088_v44 = vpop.f32.mrb[4].mxu1 }
 0x32b   : > { %v3926_v59 = vpop.f32.mrb[5].mxu0  ;;  %v4090_v31 = vpop.f32.mrb[5].mxu1 }
 0x32c   : > { %v4120_v30 = vcombine.low %v3924_v24, %v3926_v59  ;;  %v3928_v32 = vpop.f32.mrb[6].mxu0  ;;  %v4121_v33 = vcombine.low %v4088_v44, %v4090_v31  ;;  %v4092_v36 = vpop.f32.mrb[6].mxu1 }
 0x32d   : > { %v3929_v37 = vpop.f32.mrb[7].mxu0  ;;  %v4093_v41 = vpop.f32.mrb[7].mxu1 }
 0x32e   : > { %v4128_v39 = vrot.slane %v4120_v30, %v5852_v38  ;;  %v4135_v9 = vrot.slane %v4121_v33, %v5852_v38 }
 0x330   : > { %v4136_v43 = vcombine.low %v4128_v39, %v4135_v9 }
 0x332   : > { %v4219_v46 = vadd.f32 %v4215_v42, %v4136_v43 }
 0x334   : > { %v4220_v47 = vmax.f32 %v4218_v45, %v4219_v46 }
 0x336   : > { %4221 = vst [vmem:[%s298_s21] sm:$0xff] %v4220_v47 }
 0x337 PF: > { %s19_s17 = sadd.s32 1, %s5121_s17   ;;  %s5952_s12 = smov %s5105_s13 }
 0x338   : > { %p16_p9 = scmp.ge.s32.totalorder %s19_s17, 4   ;;  %s5953_s13 = smov %s5109_s14 }
 0x339   : > { %s5954_s14 = smov %s5199_s24  ;;  %s5955_s15 = smov %s5117_s16 }
 0x33a   : > { %s5956_s16 = smov %s5958_s19  ;;  %18 = sbr.rel (!%p16_p9) target bundleno = 6 (0x6), region = 96 }
 0x341   :  { %4252 = vsyncpa [#allocation4], 1 }
 0x342   :  { %4254 = vsyncpa [#allocation4 + $0x1], 1 }
 0x343   :  { %4255 = vsyncpa [#allocation6], 1 }
 0x344   :  { %4257 = vsyncpa [#allocation6 + $0x1], 1 }

</bundles_post_ra>
